<compile_context>
chip_gen: v6e
topology: v6e:2x2x1
jax: 0.10.0
libtpu: 0.0.40
codegen_flags: <defaults>
</compile_context>

<pallas_src>
import functools

import jax
import jax.numpy as jnp
from jax import lax
from jax.experimental import pallas as pl
from jax.experimental.pallas import tpu as pltpu

_LANE = 128    # vreg lane width (same on v5e / v6e / v7x)
_SUBLANE = 8   # vreg sublane count


def _round_up(x, m):
    return ((x + m - 1) // m) * m


def _cdiv(a, b):
    return (a + b - 1) // b


def _mlp_kernel(*refs, n_layers: int, matmul_dtype, dot_precision):
    """Fused MLP: refs = (x_ref, w0_ref, b0_ref, ..., w{L-1}_ref, b{L-1}_ref, o_ref)."""
    x_ref, o_ref = refs[0], refs[-1]
    layer_refs = refs[1:-1]

    h = x_ref[...].astype(jnp.float32)
    for i in range(n_layers):
        w = layer_refs[2 * i][...]          # already stored in matmul_dtype (cast at init)
        b = layer_refs[2 * i + 1][...]      # (1, d_out_pad) f32, broadcasts over rows
        # MXU matmul; f32 accumulation. Only the activation is (cheaply) cast per step.
        y = jnp.dot(h.astype(matmul_dtype), w,
                    preferred_element_type=jnp.float32,
                    precision=dot_precision)
        y = y + b                            # f32 on VPU
        if i != n_layers - 1:
            y = jnp.tanh(y)                  # f32 on EUP (hidden activation)
        h = y
    o_ref[...] = h.astype(o_ref.dtype)


def mlp_forward(x, padded_params, d_out, *, batch_tile=512, matmul_dtype=jnp.float32):
    """Run the fused MLP kernel. `padded_params` = [(w_pad[mm_dtype], b_pad(1, dout_pad) f32), ...]."""
    batch, d_in = x.shape
    n_layers = len(padded_params)
    d0_pad = padded_params[0][0].shape[0]
    dL_pad = padded_params[-1][0].shape[1]
    assert d_in <= d0_pad and d_out <= dL_pad

    # ---- batch tiling: minimize padded rows, but give v7x's 2nd TensorCore work ----
    b_al = _round_up(batch, _SUBLANE)
    n_tiles = _cdiv(b_al, batch_tile)
    if n_tiles == 1 and b_al >= 2 * _SUBLANE:
        n_tiles = 2                      # >=2 "parallel" tiles so megacore can engage
    tb = _round_up(_cdiv(b_al, n_tiles), _SUBLANE)
    grid_b = _cdiv(b_al, tb)
    b_pad = grid_b * tb                  # waste bounded by one sublane + one tile split

    # ---- pad input only if needed (skip the extra HBM round-trip when aligned) ----
    if b_pad == batch and d0_pad == d_in:
        x_pad = x
    else:
        # Padding rows/cols contribute exact zeros downstream (zero weight rows / bias
        # cols, tanh(0) == 0), so the padded pass equals the logical pass on the slice.
        x_pad = jnp.pad(x, ((0, b_pad - batch), (0, d0_pad - d_in)))

    dot_precision = (lax.Precision.HIGHEST
                     if jnp.dtype(matmul_dtype) == jnp.dtype(jnp.float32)
                     else lax.Precision.DEFAULT)

    in_specs = [pl.BlockSpec((tb, d0_pad), lambda i: (i, 0))]
    flat_params = []
    flops = 0
    transcendentals = 0
    bytes_accessed = (x_pad.size * x_pad.dtype.itemsize
                      + b_pad * dL_pad * x.dtype.itemsize)
    weight_bytes = 0
    max_width = max(d0_pad, dL_pad)
    for li, (w_pad, b2) in enumerate(padded_params):
        din_p, dout_p = w_pad.shape
        max_width = max(max_width, dout_p)
        # Grid-invariant blocks: constant index_map -> resident in VMEM, DMA'd once;
        # single-buffered because the default 2nd pipeline buffer would be pure waste.
        in_specs.append(pl.BlockSpec((din_p, dout_p), lambda i: (0, 0),
                                     pipeline_mode=pl.Buffered(1)))
        in_specs.append(pl.BlockSpec((1, dout_p), lambda i: (0, 0),
                                     pipeline_mode=pl.Buffered(1)))
        flat_params += [w_pad, b2]
        flops += 2 * b_pad * din_p * dout_p
        if li != n_layers - 1:
            transcendentals += b_pad * dout_p
        weight_bytes += (w_pad.size * w_pad.dtype.itemsize
                         + b2.size * b2.dtype.itemsize)
    bytes_accessed += weight_bytes

    # ---- explicit VMEM budget: single-buffered weights + double-buffered x/out tiles
    #      + live f32 activation slabs; capped at 48 MiB (safe on v5e/v6e/v7x). ----
    vmem_needed = (weight_bytes
                   + 2 * tb * d0_pad * x_pad.dtype.itemsize
                   + 2 * tb * dL_pad * x.dtype.itemsize
                   + 2 * tb * max_width * 4)
    vmem_limit = min(48 << 20, max(32 << 20, int(1.5 * vmem_needed)))

    kernel = functools.partial(_mlp_kernel, n_layers=n_layers,
                               matmul_dtype=matmul_dtype, dot_precision=dot_precision)

    out_pad = pl.pallas_call(
        kernel,
        out_shape=jax.ShapeDtypeStruct((b_pad, dL_pad), x.dtype),
        grid_spec=pltpu.PrefetchScalarGridSpec(
            num_scalar_prefetch=0,
            grid=(grid_b,),
            in_specs=in_specs,
            out_specs=pl.BlockSpec((tb, dL_pad), lambda i: (i, 0)),
        ),
        compiler_params=pltpu.CompilerParams(
            # batch axis is embarrassingly parallel -> megacore sharding on v7x.
            dimension_semantics=("parallel",),
            vmem_limit_bytes=vmem_limit,
        ),
        cost_estimate=pl.CostEstimate(
            flops=flops,
            transcendentals=transcendentals,
            bytes_accessed=bytes_accessed,
        ),
    )(x_pad, *flat_params)

    # Final narrow slice kept in plain JAX (keeps the kernel's output store lane-dense).
    return out_pad[:batch, :d_out]


class FeedForwardNN:
    """JAX/Pallas port of the PyTorch FeedForwardNN forward pass (fused single kernel)."""

    def __init__(self, d_in, hidden_sizes, d_out, seed=0, matmul_dtype=jnp.float32):
        self.d_in = d_in
        self.hidden_sizes = list(hidden_sizes)
        self.d_out = d_out
        self.d_layers = [d_in] + self.hidden_sizes + [d_out]
        self.n_layers = len(self.d_layers) - 1
        # matmul_dtype=jnp.bfloat16 -> ~2-3x MXU throughput on v6e/v7x; relax tolerance
        # to ~1e-2 relative. Bias add + tanh always stay f32.
        self.matmul_dtype = matmul_dtype

        key = jax.random.PRNGKey(seed)
        self.params = []          # logical (w, b) f32 -- used by the pure-JAX reference
        self.padded_params = []   # lane-padded, matmul_dtype weights -- used by the kernel
        for i in range(self.n_layers):
            fan_in, fan_out = self.d_layers[i], self.d_layers[i + 1]
            key, kw, kb = jax.random.split(key, 3)
            bound = 1.0 / (fan_in ** 0.5)  # PyTorch nn.Linear default init bounds
            w = jax.random.uniform(
                kw, (fan_in, fan_out), dtype=jnp.float32, minval=-bound, maxval=bound
            )
            b = jax.random.uniform(
                kb, (fan_out,), dtype=jnp.float32, minval=-bound, maxval=bound
            )
            self.params.append((w, b))

            # Zero-pad AND cast once at init (not per call / per grid step).
            din_p = _round_up(fan_in, _LANE)
            dout_p = _round_up(fan_out, _LANE)
            w_pad = (jnp.zeros((din_p, dout_p), jnp.float32)
                     .at[:fan_in, :fan_out].set(w)
                     .astype(matmul_dtype))
            b_pad = jnp.zeros((1, dout_p), jnp.float32).at[0, :fan_out].set(b)
            self.padded_params.append((w_pad, b_pad))

    def __call__(self, x):
        return mlp_forward(
            x, self.padded_params, self.d_out, matmul_dtype=self.matmul_dtype
        )


def _reference_forward(params, x):
    # Pure-JAX reference for correctness checking (uses the unpadded params).
    n = len(params)
    for i, (w, b) in enumerate(params):
        x = jnp.dot(x, w, precision=lax.Precision.HIGHEST) + b
        if i != n - 1:
            x = jnp.tanh(x)
    return x


if __name__ == "__main__":
    d_in, hidden_sizes, d_out = 4, [32, 32], 2
    batch = 8

    model = FeedForwardNN(d_in, hidden_sizes, d_out, seed=0)

    key = jax.random.PRNGKey(0)
    x = jax.random.normal(key, (batch, d_in), dtype=jnp.float32)

    out = model(x)
    out = jax.block_until_ready(out)

    ref = _reference_forward(model.params, x)
    assert out.shape == (batch, d_out)
    assert jnp.allclose(out, ref, atol=1e-5, rtol=1e-5)

    print("KERNEL_OK")
</pallas_src>

<mosaic_0001>
module attributes {stable_mosaic.version = 11 : i64} {
  func.func @_mlp_kernel(%arg0: i32, %arg1: memref<8x128xf32, #tpu.memory_space<vmem>>, %arg2: memref<128x128xf32, #tpu.memory_space<vmem>>, %arg3: memref<1x128xf32, #tpu.memory_space<vmem>>, %arg4: memref<128x128xf32, #tpu.memory_space<vmem>>, %arg5: memref<1x128xf32, #tpu.memory_space<vmem>>, %arg6: memref<128x128xf32, #tpu.memory_space<vmem>>, %arg7: memref<1x128xf32, #tpu.memory_space<vmem>>, %arg8: memref<8x128xf32, #tpu.memory_space<vmem>>) attributes {dimension_semantics = [#tpu.dimension_semantics<parallel>], iteration_bounds = array<i64: 1>, scalar_prefetch = 0 : i64, scratch_operands = 0 : i64, tpu.core_type = #tpu.core_type<tc>, window_params = [{transform_indices = @transform_0, window_bounds = array<i64: 8, 128>}, {pipeline_mode = #tpu.pipeline_mode<synchronous>, transform_indices = @transform_1, window_bounds = array<i64: 128, 128>}, {pipeline_mode = #tpu.pipeline_mode<synchronous>, transform_indices = @transform_2, window_bounds = array<i64: 1, 128>}, {pipeline_mode = #tpu.pipeline_mode<synchronous>, transform_indices = @transform_3, window_bounds = array<i64: 128, 128>}, {pipeline_mode = #tpu.pipeline_mode<synchronous>, transform_indices = @transform_4, window_bounds = array<i64: 1, 128>}, {pipeline_mode = #tpu.pipeline_mode<synchronous>, transform_indices = @transform_5, window_bounds = array<i64: 128, 128>}, {pipeline_mode = #tpu.pipeline_mode<synchronous>, transform_indices = @transform_6, window_bounds = array<i64: 1, 128>}, {transform_indices = @transform_7, window_bounds = array<i64: 8, 128>}]} {
    %c0 = arith.constant 0 : index
    %c0_0 = arith.constant 0 : index
    %0 = vector.load %arg1[%c0, %c0_0] : memref<8x128xf32, #tpu.memory_space<vmem>>, vector<8x128xf32>
    %c0_1 = arith.constant 0 : index
    %c0_2 = arith.constant 0 : index
    %1 = vector.load %arg2[%c0_1, %c0_2] : memref<128x128xf32, #tpu.memory_space<vmem>>, vector<128x128xf32>
    %c0_3 = arith.constant 0 : index
    %c0_4 = arith.constant 0 : index
    %2 = vector.load %arg3[%c0_3, %c0_4] : memref<1x128xf32, #tpu.memory_space<vmem>>, vector<1x128xf32>
    %cst = arith.constant dense<0.000000e+00> : vector<8x128xf32>
    %3 = tpu.matmul %0, %1, %cst {dimension_numbers = #tpu.dot_dimension_numbers<[1], [0], [0], [1], [0, 0, 1, 1], [], []>, precision = #tpu.contract_precision<fp32>} : vector<8x128xf32>, vector<128x128xf32>, vector<8x128xf32> -> vector<8x128xf32>
    %4 = vector.broadcast %2 : vector<1x128xf32> to vector<8x128xf32>
    %5 = arith.addf %3, %4 : vector<8x128xf32>
    %6 = math.tanh %5 : vector<8x128xf32>
    %c0_5 = arith.constant 0 : index
    %c0_6 = arith.constant 0 : index
    %7 = vector.load %arg4[%c0_5, %c0_6] : memref<128x128xf32, #tpu.memory_space<vmem>>, vector<128x128xf32>
    %c0_7 = arith.constant 0 : index
    %c0_8 = arith.constant 0 : index
    %8 = vector.load %arg5[%c0_7, %c0_8] : memref<1x128xf32, #tpu.memory_space<vmem>>, vector<1x128xf32>
    %cst_9 = arith.constant dense<0.000000e+00> : vector<8x128xf32>
    %9 = tpu.matmul %6, %7, %cst_9 {dimension_numbers = #tpu.dot_dimension_numbers<[1], [0], [0], [1], [0, 0, 1, 1], [], []>, precision = #tpu.contract_precision<fp32>} : vector<8x128xf32>, vector<128x128xf32>, vector<8x128xf32> -> vector<8x128xf32>
    %10 = vector.broadcast %8 : vector<1x128xf32> to vector<8x128xf32>
    %11 = arith.addf %9, %10 : vector<8x128xf32>
    %12 = math.tanh %11 : vector<8x128xf32>
    %c0_10 = arith.constant 0 : index
    %c0_11 = arith.constant 0 : index
    %13 = vector.load %arg6[%c0_10, %c0_11] : memref<128x128xf32, #tpu.memory_space<vmem>>, vector<128x128xf32>
    %c0_12 = arith.constant 0 : index
    %c0_13 = arith.constant 0 : index
    %14 = vector.load %arg7[%c0_12, %c0_13] : memref<1x128xf32, #tpu.memory_space<vmem>>, vector<1x128xf32>
    %cst_14 = arith.constant dense<0.000000e+00> : vector<8x128xf32>
    %15 = tpu.matmul %12, %13, %cst_14 {dimension_numbers = #tpu.dot_dimension_numbers<[1], [0], [0], [1], [0, 0, 1, 1], [], []>, precision = #tpu.contract_precision<fp32>} : vector<8x128xf32>, vector<128x128xf32>, vector<8x128xf32> -> vector<8x128xf32>
    %16 = vector.broadcast %14 : vector<1x128xf32> to vector<8x128xf32>
    %17 = arith.addf %15, %16 : vector<8x128xf32>
    %c0_15 = arith.constant 0 : index
    %c0_16 = arith.constant 0 : index
    %18 = vector.load %arg8[%c0_15, %c0_16] : memref<8x128xf32, #tpu.memory_space<vmem>>, vector<8x128xf32>
    tpu.vector_store %arg8[%c0_15, %c0_16], %17 {strides = array<i32>} : memref<8x128xf32, #tpu.memory_space<vmem>>, vector<8x128xf32>,
    return
  }
  func.func @transform_0(%arg0: i32) -> (i32, i32) {
    %c0_i32 = arith.constant 0 : i32
    %c0_i32_0 = arith.constant 0 : i32
    return %arg0, %c0_i32 : i32, i32
  }
  func.func @transform_1(%arg0: i32) -> (i32, i32) {
    %c0_i32 = arith.constant 0 : i32
    %c0_i32_0 = arith.constant 0 : i32
    %c0_i32_1 = arith.constant 0 : i32
    return %c0_i32, %c0_i32_0 : i32, i32
  }
  func.func @transform_2(%arg0: i32) -> (i32, i32) {
    %c0_i32 = arith.constant 0 : i32
    %c0_i32_0 = arith.constant 0 : i32
    %c0_i32_1 = arith.constant 0 : i32
    return %c0_i32, %c0_i32_0 : i32, i32
  }
  func.func @transform_3(%arg0: i32) -> (i32, i32) {
    %c0_i32 = arith.constant 0 : i32
    %c0_i32_0 = arith.constant 0 : i32
    %c0_i32_1 = arith.constant 0 : i32
    return %c0_i32, %c0_i32_0 : i32, i32
  }
  func.func @transform_4(%arg0: i32) -> (i32, i32) {
    %c0_i32 = arith.constant 0 : i32
    %c0_i32_0 = arith.constant 0 : i32
    %c0_i32_1 = arith.constant 0 : i32
    return %c0_i32, %c0_i32_0 : i32, i32
  }
  func.func @transform_5(%arg0: i32) -> (i32, i32) {
    %c0_i32 = arith.constant 0 : i32
    %c0_i32_0 = arith.constant 0 : i32
    %c0_i32_1 = arith.constant 0 : i32
    return %c0_i32, %c0_i32_0 : i32, i32
  }
  func.func @transform_6(%arg0: i32) -> (i32, i32) {
    %c0_i32 = arith.constant 0 : i32
    %c0_i32_0 = arith.constant 0 : i32
    %c0_i32_1 = arith.constant 0 : i32
    return %c0_i32, %c0_i32_0 : i32, i32
  }
  func.func @transform_7(%arg0: i32) -> (i32, i32) {
    %c0_i32 = arith.constant 0 : i32
    %c0_i32_0 = arith.constant 0 : i32
    return %arg0, %c0_i32 : i32, i32
  }
}

</mosaic_0001>

<bundles_post_ra>
// kernel: tpu_custom_call.1
= control target key start
LH: loop header
LB: loop body
LE: loop exit
PB: predicated region body
PF: predicated region fallthrough
CT: control target
= control target key end

     0   :  { %12 = vsyncpa [#allocation3], 0  ;;  %s4316_s0 = inlined_call_operand.hbm [shape: f32[8,128], index: 0, kind: input, shape index: {}]   ;;  %s4317_s1 = inlined_call_operand.hbm [shape: f32[128,128], index: 1, kind: input, shape index: {}]   ;;  %s4318_s2 = inlined_call_operand.vmem [shape: f32[1,128], index: 2, kind: input, shape index: {}]   ;;  %s4319_s3 = inlined_call_operand.hbm [shape: f32[128,128], index: 3, kind: input, shape index: {}]   ;;  %s4320_s4 = inlined_call_operand.vmem [shape: f32[1,128], index: 4, kind: input, shape index: {}]   ;;  %s4321_s5 = inlined_call_operand.hbm [shape: f32[128,128], index: 5, kind: input, shape index: {}]   ;;  %s4322_s6 = inlined_call_operand.vmem [shape: f32[1,128], index: 6, kind: input, shape index: {}]   ;;  %s4323_s7 = inlined_call_operand.hbm [shape: f32[8,128], index: 7, kind: output, shape index: {}]  }
   0x1   :  { %13 = vsyncpa [#allocation6], 0 }
   0x2   :  { %14 = vsyncpa [#allocation9], 0 }
   0x3   :  { %15 = vsyncpa [#allocation4], 0  ;;  %s3153_s24 = smov [#allocation5]  }
   0x4   :  { %s31_s25 = sshll.u32 %s3153_s24, 4  ;;  %s32_s25 = int_to_ptr.vmem [resolvable:$true] %s31_s25 }
   0x5   :  { %s3053_s26 = scalar_lea.vmem %s32_s25, 2048  ;;  %p3058_p1 = scmp.lt.s32.totalorder %s32_s25, %s32_s25 }
   0x6   :  { %p3054_p0 = scmp.ne.s32.totalorder %s32_s25, %s3053_s26  ;;  %p3059_p2 = scmp.lt.s32.totalorder %s3053_s26, %s3053_s26 }
   0x8   :  { %p3060_p3 = por %p3059_p2, %p3058_p1 }
   0xa   :  { %p3061_p4 = pnand %p3060_p3, %p3054_p0 }
   0xc   :  { %3064 = shalt.err (!%p3061_p4)
}
   0xd   :  { %s3154_s27 = smov 128   ;;  %s3155_s28 = smov 8  }
   0xe   :  { %37 = dma.hbm_to_vmem [thread:$0]  %s4317_s1, 2048, %s32_s25, [#allocation6], %s3154_s27, %s3154_s27, %s3155_s28  }
   0xf   :  { %s3156_s8 = smov [#allocation2]   ;;  %s3157_s10 = smov [#allocation7]  }
  0x10   :  { %s22_s9 = sshll.u32 %s3156_s8, 4  ;;  %s45_s11 = sshll.u32 %s3157_s10, 4  ;;  %s23_s9 = int_to_ptr.vmem [resolvable:$true] %s22_s9  ;;  %s46_s11 = int_to_ptr.vmem [resolvable:$true] %s45_s11 }
  0x11   :  { %s3073_s12 = scalar_lea.vmem %s23_s9, 128  ;;  %p3078_p6 = scmp.lt.s32.totalorder %s23_s9, %s23_s9 }
  0x12   :  { %p3074_p5 = scmp.ne.s32.totalorder %s23_s9, %s3073_s12  ;;  %p3079_p7 = scmp.lt.s32.totalorder %s3073_s12, %s3073_s12 }
  0x14   :  { %p3080_p8 = por %p3079_p7, %p3078_p6 }
  0x16   :  { %p3081_p9 = pnand %p3080_p8, %p3074_p5 }
  0x18   :  { %3084 = shalt.err (!%p3081_p9)
}
  0x19   :  { %25 = dma.hbm_to_vmem [thread:$0]  %s4316_s0, 128, %s23_s9, [#allocation3]  }
  0x1a   :  { %s3093_s15 = scalar_lea.vmem %s46_s11, 2048  ;;  %p3098_p11 = scmp.lt.s32.totalorder %s46_s11, %s46_s11 }
  0x1b   :  { %p3094_p10 = scmp.ne.s32.totalorder %s46_s11, %s3093_s15  ;;  %p3099_p12 = scmp.lt.s32.totalorder %s3093_s15, %s3093_s15 }
  0x1d   :  { %p3100_p13 = por %p3099_p12, %p3098_p11 }
  0x1f   :  { %p3101_p0 = pnand %p3100_p13, %p3094_p10 }
  0x21   :  { %3104 = shalt.err (!%p3101_p0)
}
  0x22   :  { %51 = dma.hbm_to_vmem [thread:$0]  %s4319_s3, 2048, %s46_s11, [#allocation6], %s3154_s27, %s3154_s27, %s3155_s28  }
  0x23   :  { %s3158_s17 = smov [#allocation8]  }
  0x24   :  { %s59_s18 = sshll.u32 %s3158_s17, 4  ;;  %s60_s18 = int_to_ptr.vmem [resolvable:$true] %s59_s18 }
  0x25   :  { %s3113_s19 = scalar_lea.vmem %s60_s18, 2048  ;;  %p3118_p2 = scmp.lt.s32.totalorder %s60_s18, %s60_s18 }
  0x26   :  { %p3114_p1 = scmp.ne.s32.totalorder %s60_s18, %s3113_s19  ;;  %p3119_p3 = scmp.lt.s32.totalorder %s3113_s19, %s3113_s19 }
  0x28   :  { %p3120_p4 = por %p3119_p3, %p3118_p2 }
  0x2a   :  { %p3121_p5 = pnand %p3120_p4, %p3114_p1 }
  0x2c   :  { %3124 = shalt.err (!%p3121_p5)
}
  0x2d   :  { %65 = dma.hbm_to_vmem [thread:$0]  %s4321_s5, 2048, %s60_s18, [#allocation9], %s3154_s27, %s3154_s27, %s3155_s28  }
  0x2e   :  { %3145 = dma.done.wait [#allocation3], 128  }
  0x2f   :  { %3146 = vsyncadd [#allocation3], 4294967168 }
  0x30   :  { %3147 = dma.done.wait [#allocation6], 4096  }
  0x31   :  { %3148 = vsyncadd [#allocation6], 4294963200 }
  0x32   :  { %3149 = dma.done.wait [#allocation9], 2048  }
  0x33   :  { %3150 = vsyncadd [#allocation9], 4294965248  ;;  %v3159_v0 = vmov 0.0   ;;  %vm3160_vm0 = vmmov 0   ;;  %v96_v1 = vld [vmem:[#allocation5 + $0x78] sm:$0xff]  ;;  %v95_v2 = vld [vmem:[#allocation5 + $0x70] sm:$0xff] }
  0x34   :  { %2402 = vmatprep.subr.mxu0 %v3159_v0  ;;  %2437 = vmatprep.subr.mxu1 %v3159_v0  ;;  %v94_v3 = vld [vmem:[#allocation5 + $0x68] sm:$0xff]  ;;  %v3229_v4 = vand.u32 4294901760, %v96_v1  ;;  %v3231_v5 = vand.u32 4294901760, %v95_v2  ;;  %v93_v7 = vld [vmem:[#allocation5 + $0x60] sm:$0xff]  ;;  %v92_v8 = vld [vmem:[#allocation5 + $0x58] sm:$0xff]  ;;  %s3161_s23 = smov [#allocation10]  }
  0x35   :  { %2434 = vmatprep.mubr.msk.f32.mxu0 %vm3160_vm0, %v3159_v0  ;;  %2469 = vmatprep.mubr.msk.f32.mxu1 %vm3160_vm0, %v3159_v0  ;;  %v3233_v6 = vand.u32 4294901760, %v94_v3  ;;  %v91_v9 = vld [vmem:[#allocation5 + $0x50] sm:$0xff]  ;;  %v3235_v10 = vand.u32 4294901760, %v93_v7  ;;  %v3237_v11 = vand.u32 4294901760, %v92_v8  ;;  %v90_v13 = vld [vmem:[#allocation5 + $0x48] sm:$0xff]  ;;  %v89_v14 = vld [vmem:[#allocation5 + $0x40] sm:$0xff] }
  0x36   :  { %v3239_v12 = vand.u32 4294901760, %v91_v9  ;;  %2403 = vmatpush3.msra.mxu0 %v3229_v4  ;;  %v3243_v15 = vsub.f32 %v96_v1, %v3229_v4  ;;  %v3246_v16 = vsub.f32 %v95_v2, %v3231_v5  ;;  %v3248_v17 = vand.u32 4294901760, %v90_v13  ;;  %v88_v19 = vld [vmem:[#allocation5 + $0x38] sm:$0xff]  ;;  %v87_v26 = vld [vmem:[#allocation5 + $0x30] sm:$0xff]  ;;  %v86_v36 = vld [vmem:[#allocation5 + $0x28] sm:$0xff]  ;;  %s2082_s24 = sshll.u32 %s3161_s23, 4  ;;  %s2083_s24 = int_to_ptr.vmem [resolvable:$true] %s2082_s24 }
  0x37   :  { %v3251_v18 = vsub.f32 %v94_v3, %v3233_v6  ;;  %2404 = vmatprep.subr.mxu0 %v3159_v0  ;;  %v3255_v20 = vsub.f32 %v93_v7, %v3235_v10  ;;  %v3258_v21 = vsub.f32 %v92_v8, %v3237_v11  ;;  %v3264_v25 = vand.u32 4294901760, %v89_v14  ;;  %v85_v41 = vld [vmem:[#allocation5 + $0x20] sm:$0xff]  ;;  %v84_v49 = vld [vmem:[#allocation5 + $0x18] sm:$0xff]  ;;  %v83_v54 = vld [vmem:[#allocation5 + $0x10] sm:$0xff]  ;;  %s3125_s25 = scalar_lea.vmem %s2083_s24, 128  ;;  %p3130_p7 = scmp.lt.s32.totalorder %s2083_s24, %s2083_s24 }
  0x38   :  { %2405 = vmatpush3.msra.mxu0 %v3231_v5  ;;  %v198_v22 = vand.u32 4294901760, %v3243_v15  ;;  %v205_v23 = vand.u32 4294901760, %v3246_v16  ;;  %v3268_v28 = vand.u32 4294901760, %v88_v19  ;;  %v3272_v30 = vsub.f32 %v91_v9, %v3239_v12  ;;  %v80_v50 = vld [vmem:[#allocation2] sm:$0xff]  ;;  %v82_v60 = vld [vmem:[#allocation5 + $0x8] sm:$0xff]  ;;  %v81_v7 = vld [vmem:[#allocation5] sm:$0xff]  ;;  %p3126_p6 = scmp.ne.s32.totalorder %s2083_s24, %s3125_s25  ;;  %p3131_p8 = scmp.lt.s32.totalorder %s3125_s25, %s3125_s25 }
  0x39   :  { %v212_v24 = vand.u32 4294901760, %v3251_v18  ;;  %2406 = vmatprep.subr.mxu0 %v3159_v0  ;;  %v219_v27 = vand.u32 4294901760, %v3255_v20  ;;  %v226_v29 = vand.u32 4294901760, %v3258_v21  ;;  %v3285_v34 = vsub.f32 %v90_v13, %v3248_v17 }
  0x3a   :  { %2407 = vmatpush3.msra.mxu0 %v3233_v6  ;;  %v199_v31 = vsub.f32 %v3243_v15, %v198_v22  ;;  %v206_v32 = vsub.f32 %v3246_v16, %v205_v23  ;;  %v3288_v35 = vand.u32 4294901760, %v87_v26  ;;  %v233_v40 = vand.u32 4294901760, %v3272_v30  ;;  %p3132_p9 = por %p3131_p8, %p3130_p7 }
  0x3b   :  { %v213_v33 = vsub.f32 %v3251_v18, %v212_v24  ;;  %2408 = vmatprep.subr.mxu0 %v3159_v0  ;;  %v220_v39 = vsub.f32 %v3255_v20, %v219_v27  ;;  %v227_v42 = vsub.f32 %v3258_v21, %v226_v29  ;;  %v3300_v43 = vsub.f32 %v89_v14, %v3264_v25 }
  0x3c   :  { %2409 = vmatpush3.msra.mxu0 %v3235_v10  ;;  %v200_v37 = vand.u32 4294901760, %v199_v31  ;;  %v207_v38 = vand.u32 4294901760, %v206_v32  ;;  %v3303_v45 = vand.u32 4294901760, %v86_v36  ;;  %v240_v46 = vand.u32 4294901760, %v3285_v34  ;;  %p3133_p10 = pnand %p3132_p9, %p3126_p6 }
  0x3d   :  { %2410 = vmatprep.subr.mxu0 %v3159_v0  ;;  %v214_v44 = vand.u32 4294901760, %v213_v33  ;;  %v3307_v47 = vsub.f32 %v88_v19, %v3268_v28  ;;  %v3311_v48 = vand.u32 4294901760, %v85_v41  ;;  %v221_v51 = vand.u32 4294901760, %v220_v39 }
  0x3e   :  { %2411 = vmatpush3.msra.mxu0 %v3237_v11  ;;  %2438 = vmatpush3.msra.mxu1 %v200_v37  ;;  %v234_v52 = vsub.f32 %v3272_v30, %v233_v40  ;;  %v247_v53 = vand.u32 4294901760, %v3300_v43  ;;  %v3319_v55 = vsub.f32 %v87_v26, %v3288_v35  ;;  %v228_v56 = vand.u32 4294901760, %v227_v42 }
  0x3f   :  { %2412 = vmatprep.subr.mxu0 %v3159_v0  ;;  %2439 = vmatprep.subr.mxu1 %v3159_v0  ;;  %v254_v57 = vand.u32 4294901760, %v3307_v47  ;;  %v241_v58 = vsub.f32 %v3285_v34, %v240_v46  ;;  %v3328_v59 = vand.u32 4294901760, %v84_v49  ;;  %v3331_v61 = vsub.f32 %v86_v36, %v3303_v45 }
  0x40   :  { %2413 = vmatpush3.msra.mxu0 %v3239_v12  ;;  %2440 = vmatpush3.msra.mxu1 %v207_v38  ;;  %v3333_v62 = vand.u32 4294901760, %v80_v50  ;;  %v3337_v63 = vand.u32 4294901760, %v83_v54  ;;  %v235_v1 = vand.u32 4294901760, %v234_v52  ;;  %v248_v2 = vsub.f32 %v3300_v43, %v247_v53 }
  0x41   :  { %2414 = vmatprep.subr.mxu0 %v3159_v0  ;;  %2441 = vmatprep.subr.mxu1 %v3159_v0  ;;  %v261_v3 = vand.u32 4294901760, %v3319_v55  ;;  %v3345_v8 = vsub.f32 %v85_v41, %v3311_v48  ;;  %v255_v9 = vsub.f32 %v3307_v47, %v254_v57  ;;  %v3352_v13 = vand.u32 4294901760, %v82_v60 }
  0x42   :  { %2415 = vmatpush3.msra.mxu0 %v3248_v17  ;;  %2442 = vmatpush3.msra.mxu1 %v214_v44  ;;  %v242_v14 = vand.u32 4294901760, %v241_v58  ;;  %v268_v19 = vand.u32 4294901760, %v3331_v61  ;;  %v3357_v26 = vsub.f32 %v80_v50, %v3333_v62  ;;  %v3360_v31 = vsub.f32 %v84_v49, %v3328_v59 }
  0x43   :  { %2416 = vmatprep.subr.mxu0 %v3159_v0  ;;  %2443 = vmatprep.subr.mxu1 %v3159_v0  ;;  %v3364_v32 = vand.u32 4294901760, %v81_v7  ;;  %v249_v33 = vand.u32 4294901760, %v248_v2  ;;  %v262_v36 = vsub.f32 %v3319_v55, %v261_v3  ;;  %v275_v37 = vand.u32 4294901760, %v3345_v8 }
  0x44   :  { %2417 = vmatpush3.msra.mxu0 %v3264_v25  ;;  %2444 = vmatpush3.msra.mxu1 %v221_v51  ;;  %v3372_v38 = vsub.f32 %v83_v54, %v3337_v63  ;;  %v256_v39 = vand.u32 4294901760, %v255_v9  ;;  %v269_v41 = vsub.f32 %v3331_v61, %v268_v19  ;;  %v187_v42 = vand.u32 4294901760, %v3357_v26 }
  0x45   :  { %2418 = vmatprep.subr.mxu0 %v3159_v0  ;;  %2445 = vmatprep.subr.mxu1 %v3159_v0  ;;  %v282_v44 = vand.u32 4294901760, %v3360_v31  ;;  %v3383_v49 = vsub.f32 %v82_v60, %v3352_v13  ;;  %v263_v50 = vand.u32 4294901760, %v262_v36  ;;  %v276_v51 = vsub.f32 %v3345_v8, %v275_v37 }
  0x46   :  { %2419 = vmatpush3.msra.mxu0 %v3268_v28  ;;  %2446 = vmatpush3.msra.mxu1 %v228_v56  ;;  %v289_v52 = vand.u32 4294901760, %v3372_v38  ;;  %v3393_v54 = vsub.f32 %v81_v7, %v3364_v32  ;;  %v270_v56 = vand.u32 4294901760, %v269_v41  ;;  %v188_v58 = vsub.f32 %v3357_v26, %v187_v42 }
  0x47   :  { %2420 = vmatprep.subr.mxu0 %v3159_v0  ;;  %2447 = vmatprep.subr.mxu1 %v3159_v0  ;;  %v283_v60 = vsub.f32 %v3360_v31, %v282_v44  ;;  %v277_v2 = vand.u32 4294901760, %v276_v51 }
  0x48   :  { %2421 = vmatpush3.msra.mxu0 %v3288_v35  ;;  %2448 = vmatpush3.msra.mxu1 %v235_v1  ;;  %v296_v1 = vand.u32 4294901760, %v3383_v49  ;;  %v290_v7 = vsub.f32 %v3372_v38, %v289_v52  ;;  %v303_v9 = vand.u32 4294901760, %v3393_v54 }
  0x49   :  { %2422 = vmatprep.subr.mxu0 %v3159_v0  ;;  %2449 = vmatprep.subr.mxu1 %v3159_v0 }
  0x4a   :  { %2423 = vmatpush3.msra.mxu0 %v3303_v45  ;;  %2450 = vmatpush3.msra.mxu1 %v242_v14  ;;  %v189_v14 = vand.u32 4294901760, %v188_v58  ;;  %v297_v36 = vsub.f32 %v3383_v49, %v296_v1  ;;  %v304_v41 = vsub.f32 %v3393_v54, %v303_v9  ;;  %v751_v58 = vld [vmem:[#allocation7 + $0x28] sm:$0xff] }
  0x4b   :  { %2424 = vmatprep.subr.mxu0 %v3159_v0  ;;  %2451 = vmatprep.subr.mxu1 %v3159_v0 }
  0x4c   :  { %2425 = vmatpush3.msra.mxu0 %v3311_v48  ;;  %2452 = vmatpush3.msra.mxu1 %v249_v33  ;;  %v284_v33 = vand.u32 4294901760, %v283_v60  ;;  %v305_v51 = vand.u32 4294901760, %v304_v41 }
  0x4d   :  { %2426 = vmatprep.subr.mxu0 %v3159_v0  ;;  %2453 = vmatprep.subr.mxu1 %v3159_v0 }
  0x4e   :  { %2427 = vmatpush3.msra.mxu0 %v3328_v59  ;;  %2454 = vmatpush3.msra.mxu1 %v256_v39  ;;  %v291_v39 = vand.u32 4294901760, %v290_v7  ;;  %v3694_v7 = vand.u32 4294901760, %v751_v58 }
  0x4f   :  { %2428 = vmatprep.subr.mxu0 %v3159_v0  ;;  %2455 = vmatprep.subr.mxu1 %v3159_v0 }
  0x50   :  { %2429 = vmatpush3.msra.mxu0 %v3337_v63  ;;  %2456 = vmatpush3.msra.mxu1 %v263_v50  ;;  %v298_v50 = vand.u32 4294901760, %v297_v36 }
  0x51   :  { %2430 = vmatprep.subr.mxu0 %v3159_v0  ;;  %2457 = vmatprep.subr.mxu1 %v3159_v0 }
  0x52   :  { %2431 = vmatpush3.msra.mxu0 %v3352_v13  ;;  %2458 = vmatpush3.msra.mxu1 %v270_v56 }
  0x53   :  { %2432 = vmatprep.subr.mxu0 %v3159_v0  ;;  %2459 = vmatprep.subr.mxu1 %v3159_v0 }
  0x54   :  { %2433 = vmatpush3.msra.mxu0 %v3364_v32  ;;  %2460 = vmatpush3.msra.mxu1 %v277_v2 }
  0x55   :  { %2461 = vmatprep.subr.mxu1 %v3159_v0  ;;  %2472 = vmatprep.subr.mxu0 %v3159_v0 }
  0x56   :  { %2435 = vmatmul.mubr.f32.vlgmr.msra.gmra.mxu0 %v189_v14  ;;  %2462 = vmatpush3.msra.mxu1 %v284_v33  ;;  %v750_v14 = vld [vmem:[#allocation7 + $0x20] sm:$0xff] }
  0x57   :  { %2473 = vmatpush3.msra.mxu0 %v3243_v15  ;;  %2463 = vmatprep.subr.mxu1 %v3159_v0  ;;  %v3709_v41 = vand.u32 4294901760, %v750_v14 }
  0x58   :  { %2474 = vmatprep.subr.mxu0 %v3159_v0  ;;  %2464 = vmatpush3.msra.mxu1 %v291_v39  ;;  %v3707_v39 = vsub.f32 %v751_v58, %v3694_v7 }
  0x59   :  { %2475 = vmatpush3.msra.mxu0 %v3246_v16  ;;  %2465 = vmatprep.subr.mxu1 %v3159_v0 }
  0x5a   :  { %2476 = vmatprep.subr.mxu0 %v3159_v0  ;;  %2466 = vmatpush3.msra.mxu1 %v298_v50 }
  0x5b   :  { %2477 = vmatpush3.msra.mxu0 %v3251_v18  ;;  %2467 = vmatprep.subr.mxu1 %v3159_v0 }
  0x5c   :  { %2478 = vmatprep.subr.mxu0 %v3159_v0  ;;  %2468 = vmatpush3.msra.mxu1 %v305_v51  ;;  %v749_v51 = vld [vmem:[#allocation7 + $0x18] sm:$0xff] }
  0x5d   :  { %2479 = vmatpush3.msra.mxu0 %v3255_v20  ;;  %2470 = vmatmul.mubr.f32.vlgmr.msra.gmra.mxu1 %v3333_v62 }
  0x5e   :  { %2480 = vmatprep.subr.mxu0 %v3159_v0  ;;  %2507 = vmatprep.subr.mxu1 %v3159_v0 }
  0x5f   :  { %2481 = vmatpush3.msra.mxu0 %v3258_v21  ;;  %2508 = vmatpush3.msra.mxu1 %v3229_v4 }
  0x60   :  { %2482 = vmatprep.subr.mxu0 %v3159_v0  ;;  %2509 = vmatprep.subr.mxu1 %v3159_v0 }
  0x61   :  { %2483 = vmatpush3.msra.mxu0 %v3272_v30  ;;  %2510 = vmatpush3.msra.mxu1 %v3231_v5 }
  0x62   :  { %2484 = vmatprep.subr.mxu0 %v3159_v0  ;;  %2511 = vmatprep.subr.mxu1 %v3159_v0 }
  0x63   :  { %2485 = vmatpush3.msra.mxu0 %v3285_v34  ;;  %2512 = vmatpush3.msra.mxu1 %v3233_v6  ;;  %v757_v34 = vld [vmem:[#allocation7 + $0x58] sm:$0xff] }
  0x64   :  { %2486 = vmatprep.subr.mxu0 %v3159_v0  ;;  %2513 = vmatprep.subr.mxu1 %v3159_v0 }
  0x65   :  { %2487 = vmatpush3.msra.mxu0 %v3300_v43  ;;  %2514 = vmatpush3.msra.mxu1 %v3235_v10  ;;  %v756_v43 = vld [vmem:[#allocation7 + $0x50] sm:$0xff] }
  0x66   :  { %2488 = vmatprep.subr.mxu0 %v3159_v0  ;;  %2515 = vmatprep.subr.mxu1 %v3159_v0 }
  0x67   :  { %2489 = vmatpush3.msra.mxu0 %v3307_v47  ;;  %2516 = vmatpush3.msra.mxu1 %v3237_v11  ;;  %v3641_v47 = vand.u32 4294901760, %v756_v43 }
  0x68   :  { %2490 = vmatprep.subr.mxu0 %v3159_v0  ;;  %2517 = vmatprep.subr.mxu1 %v3159_v0 }
  0x69   :  { %2491 = vmatpush3.msra.mxu0 %v3319_v55  ;;  %2518 = vmatpush3.msra.mxu1 %v3239_v12 }
  0x6a   :  { %2492 = vmatprep.subr.mxu0 %v3159_v0  ;;  %2519 = vmatprep.subr.mxu1 %v3159_v0 }
  0x6b   :  { %2493 = vmatpush3.msra.mxu0 %v3331_v61  ;;  %2520 = vmatpush3.msra.mxu1 %v3248_v17  ;;  %v754_v61 = vld [vmem:[#allocation7 + $0x40] sm:$0xff] }
  0x6c   :  { %2494 = vmatprep.subr.mxu0 %v3159_v0  ;;  %2521 = vmatprep.subr.mxu1 %v3159_v0 }
  0x6d   :  { %2495 = vmatpush3.msra.mxu0 %v3345_v8  ;;  %2522 = vmatpush3.msra.mxu1 %v3264_v25 }
  0x6e   :  { %2496 = vmatprep.subr.mxu0 %v3159_v0  ;;  %2523 = vmatprep.subr.mxu1 %v3159_v0 }
  0x6f   :  { %2497 = vmatpush3.msra.mxu0 %v3360_v31  ;;  %2524 = vmatpush3.msra.mxu1 %v3268_v28 }
  0x70   :  { %2498 = vmatprep.subr.mxu0 %v3159_v0  ;;  %2525 = vmatprep.subr.mxu1 %v3159_v0 }
  0x71   :  { %2499 = vmatpush3.msra.mxu0 %v3372_v38  ;;  %2526 = vmatpush3.msra.mxu1 %v3288_v35 }
  0x72   :  { %2500 = vmatprep.subr.mxu0 %v3159_v0  ;;  %2527 = vmatprep.subr.mxu1 %v3159_v0 }
  0x73   :  { %2501 = vmatpush3.msra.mxu0 %v3383_v49  ;;  %2528 = vmatpush3.msra.mxu1 %v3303_v45 }
  0x74   :  { %2502 = vmatprep.subr.mxu0 %v3159_v0  ;;  %2529 = vmatprep.subr.mxu1 %v3159_v0 }
  0x75   :  { %2503 = vmatpush3.msra.mxu0 %v3393_v54  ;;  %2504 = vmatprep.mubr.msk.f32.mxu0 %vm3160_vm0, %v3159_v0 }
  0x76   :  { %2530 = vmatpush3.msra.mxu1 %v3311_v48  ;;  %2505 = vmatmul.mubr.f32.vlgmr.msra.gmra.mxu0 %v3357_v26 }
  0x77   :  { %2531 = vmatprep.subr.mxu1 %v3159_v0  ;;  %2542 = vmatprep.subr.mxu0 %v3159_v0 }
  0x78   :  { %2532 = vmatpush3.msra.mxu1 %v3328_v59  ;;  %2543 = vmatpush3.msra.mxu0 %v198_v22 }
  0x79   :  { %2533 = vmatprep.subr.mxu1 %v3159_v0  ;;  %2544 = vmatprep.subr.mxu0 %v3159_v0 }
  0x7a   :  { %2534 = vmatpush3.msra.mxu1 %v3337_v63  ;;  %2545 = vmatpush3.msra.mxu0 %v205_v23 }
  0x7b   :  { %2535 = vmatprep.subr.mxu1 %v3159_v0  ;;  %2546 = vmatprep.subr.mxu0 %v3159_v0 }
  0x7c   :  { %2536 = vmatpush3.msra.mxu1 %v3352_v13  ;;  %2547 = vmatpush3.msra.mxu0 %v212_v24 }
  0x7d   :  { %2537 = vmatprep.subr.mxu1 %v3159_v0  ;;  %2548 = vmatprep.subr.mxu0 %v3159_v0 }
  0x7e   :  { %2538 = vmatpush3.msra.mxu1 %v3364_v32  ;;  %2539 = vmatprep.mubr.msk.f32.mxu1 %vm3160_vm0, %v3159_v0 }
  0x7f   :  { %2549 = vmatpush3.msra.mxu0 %v219_v27  ;;  %2540 = vmatmul.mubr.f32.vlgmr.msra.gmra.mxu1 %v187_v42  ;;  %v752_v42 = vld [vmem:[#allocation7 + $0x30] sm:$0xff] }
  0x80   :  { %2550 = vmatprep.subr.mxu0 %v3159_v0  ;;  %2577 = vmatprep.subr.mxu1 %v3159_v0  ;;  %v3684_v54 = vand.u32 4294901760, %v752_v42 }
  0x81   :  { %2551 = vmatpush3.msra.mxu0 %v226_v29  ;;  %2578 = vmatpush3.msra.mxu1 %v3229_v4  ;;  %v761_v4 = vld [vmem:[#allocation7 + $0x78] sm:$0xff]  ;;  %v758_v29 = vld [vmem:[#allocation7 + $0x60] sm:$0xff] }
  0x82   :  { %2552 = vmatprep.subr.mxu0 %v3159_v0  ;;  %2579 = vmatprep.subr.mxu1 %v3159_v0  ;;  %v3627_v30 = vand.u32 4294901760, %v758_v29  ;;  %v3692_v2 = vsub.f32 %v752_v42, %v3684_v54 }
  0x83   :  { %2553 = vmatpush3.msra.mxu0 %v233_v40  ;;  %2580 = vmatpush3.msra.mxu1 %v3231_v5  ;;  %v760_v5 = vld [vmem:[#allocation7 + $0x70] sm:$0xff]  ;;  %v3633_v40 = vand.u32 4294901760, %v757_v34 }
  0x84   :  { %2554 = vmatprep.subr.mxu0 %v3159_v0  ;;  %2581 = vmatprep.subr.mxu1 %v3159_v0  ;;  %v926_v36 = vand.u32 4294901760, %v3692_v2 }
  0x85   :  { %2555 = vmatpush3.msra.mxu0 %v240_v46  ;;  %2582 = vmatpush3.msra.mxu1 %v3233_v6  ;;  %v759_v6 = vld [vmem:[#allocation7 + $0x68] sm:$0xff]  ;;  %v3639_v46 = vsub.f32 %v757_v34, %v3633_v40 }
  0x86   :  { %2556 = vmatprep.subr.mxu0 %v3159_v0  ;;  %2583 = vmatprep.subr.mxu1 %v3159_v0  ;;  %v747_v34 = vld [vmem:[#allocation7 + $0x8] sm:$0xff] }
  0x87   :  { %2557 = vmatpush3.msra.mxu0 %v247_v53  ;;  %2584 = vmatpush3.msra.mxu1 %v3235_v10  ;;  %v3592_v10 = vand.u32 4294901760, %v761_v4  ;;  %v891_v55 = vand.u32 4294901760, %v3639_v46 }
  0x88   :  { %2558 = vmatprep.subr.mxu0 %v3159_v0  ;;  %2585 = vmatprep.subr.mxu1 %v3159_v0 }
  0x89   :  { %2559 = vmatpush3.msra.mxu0 %v254_v57  ;;  %2586 = vmatpush3.msra.mxu1 %v3237_v11  ;;  %v3594_v11 = vand.u32 4294901760, %v760_v5  ;;  %v3599_v15 = vsub.f32 %v761_v4, %v3592_v10  ;;  %v3650_v57 = vsub.f32 %v756_v43, %v3641_v47  ;;  %v746_v43 = vld [vmem:[#allocation7] sm:$0xff] }
  0x8a   :  { %2560 = vmatprep.subr.mxu0 %v3159_v0  ;;  %2587 = vmatprep.subr.mxu1 %v3159_v0 }
  0x8b   :  { %2561 = vmatpush3.msra.mxu0 %v261_v3  ;;  %2588 = vmatpush3.msra.mxu1 %v3239_v12  ;;  %v3596_v12 = vand.u32 4294901760, %v759_v6  ;;  %v3602_v16 = vsub.f32 %v760_v5, %v3594_v11  ;;  %v863_v18 = vand.u32 4294901760, %v3599_v15  ;;  %v898_v3 = vand.u32 4294901760, %v3650_v57 }
  0x8c   :  { %2562 = vmatprep.subr.mxu0 %v3159_v0  ;;  %2589 = vmatprep.subr.mxu1 %v3159_v0  ;;  %v927_v5 = vsub.f32 %v3692_v2, %v926_v36 }
  0x8d   :  { %2563 = vmatpush3.msra.mxu0 %v268_v19  ;;  %2590 = vmatpush3.msra.mxu1 %v3248_v17  ;;  %v3605_v17 = vsub.f32 %v759_v6, %v3596_v12  ;;  %v870_v20 = vand.u32 4294901760, %v3602_v16  ;;  %v864_v22 = vsub.f32 %v3599_v15, %v863_v18  ;;  %v753_v19 = vld [vmem:[#allocation7 + $0x38] sm:$0xff]  ;;  %v899_v31 = vsub.f32 %v3650_v57, %v898_v3 }
  0x8e   :  { %2564 = vmatprep.subr.mxu0 %v3159_v0  ;;  %2591 = vmatprep.subr.mxu1 %v3159_v0  ;;  %v933_v6 = vand.u32 4294901760, %v3707_v39 }
  0x8f   :  { %2565 = vmatpush3.msra.mxu0 %v275_v37  ;;  %2592 = vmatpush3.msra.mxu1 %v3264_v25  ;;  %v877_v21 = vand.u32 4294901760, %v3605_v17  ;;  %v871_v23 = vsub.f32 %v3602_v16, %v870_v20  ;;  %v865_v25 = vand.u32 4294901760, %v864_v22  ;;  %v3671_v37 = vand.u32 4294901760, %v753_v19 }
  0x90   :  { %2566 = vmatprep.subr.mxu0 %v3159_v0  ;;  %2593 = vmatprep.subr.mxu1 %v3159_v0  ;;  %v3719_v22 = vsub.f32 %v750_v14, %v3709_v41 }
  0x91   :  { %2567 = vmatpush3.msra.mxu0 %v282_v44  ;;  %2594 = vmatpush3.msra.mxu1 %v3268_v28  ;;  %v878_v24 = vsub.f32 %v3605_v17, %v877_v21  ;;  %v872_v27 = vand.u32 4294901760, %v871_v23  ;;  %v900_v44 = vand.u32 4294901760, %v899_v31  ;;  %v3722_v23 = vand.u32 4294901760, %v749_v51 }
  0x92   :  { %2568 = vmatprep.subr.mxu0 %v3159_v0  ;;  %2595 = vmatprep.subr.mxu1 %v3159_v0 }
  0x93   :  { %2569 = vmatpush3.msra.mxu0 %v289_v52  ;;  %2596 = vmatpush3.msra.mxu1 %v3288_v35  ;;  %v879_v28 = vand.u32 4294901760, %v878_v24  ;;  %v3631_v35 = vsub.f32 %v758_v29, %v3627_v30  ;;  %v3682_v52 = vsub.f32 %v753_v19, %v3671_v37  ;;  %v748_v24 = vld [vmem:[#allocation7 + $0x10] sm:$0xff] }
  0x94   :  { %2570 = vmatprep.subr.mxu0 %v3159_v0  ;;  %2597 = vmatprep.subr.mxu1 %v3159_v0  ;;  %v3730_v29 = vand.u32 4294901760, %v748_v24 }
  0x95   :  { %2571 = vmatpush3.msra.mxu0 %v296_v1  ;;  %2598 = vmatpush3.msra.mxu1 %v3303_v45  ;;  %v884_v45 = vand.u32 4294901760, %v3631_v35  ;;  %v919_v1 = vand.u32 4294901760, %v3682_v52 }
  0x96   :  { %2572 = vmatprep.subr.mxu0 %v3159_v0  ;;  %2599 = vmatprep.subr.mxu1 %v3159_v0  ;;  %v3746_v19 = vsub.f32 %v748_v24, %v3730_v29 }
  0x97   :  { %2573 = vmatpush3.msra.mxu0 %v303_v9  ;;  %2574 = vmatprep.mubr.msk.f32.mxu0 %vm3160_vm0, %v3159_v0  ;;  %v885_v53 = vsub.f32 %v3631_v35, %v884_v45  ;;  %v920_v33 = vsub.f32 %v3682_v52, %v919_v1 }
  0x98   :  { %2600 = vmatpush3.msra.mxu1 %v3311_v48  ;;  %2575 = vmatmul.mubr.f32.vlgmr.msra.gmra.mxu0 %v3333_v62  ;;  %v755_v48 = vld [vmem:[#allocation7 + $0x48] sm:$0xff] }
  0x99   :  { %2601 = vmatprep.subr.mxu1 %v3159_v0  ;;  %2609 = vmatprep.mubr.msk.f32.mxu1 %vm3160_vm0, %v3159_v0  ;;  %v921_v4 = vand.u32 4294901760, %v920_v33 }
  0x9a   :  { %2602 = vmatpush3.msra.mxu1 %v3328_v59  ;;  %2612 = vmatprep.subr.mxu0 %v3159_v0  ;;  %v3652_v59 = vand.u32 4294901760, %v755_v48 }
  0x9b   :  { %2603 = vmatprep.subr.mxu1 %v3159_v0  ;;  %2644 = vmatprep.mubr.msk.f32.mxu0 %vm3160_vm0, %v3159_v0 }
  0x9c   :  { %2604 = vmatpush3.msra.mxu1 %v3337_v63  ;;  %2613 = vmatpush3.msra.mxu0 %v3592_v10  ;;  %v892_v63 = vsub.f32 %v3639_v46, %v891_v55  ;;  %v3661_v8 = vsub.f32 %v755_v48, %v3652_v59  ;;  %v3734_v48 = vsub.f32 %v749_v51, %v3722_v23 }
  0x9d   :  { %2605 = vmatprep.subr.mxu1 %v3159_v0  ;;  %2614 = vmatprep.subr.mxu0 %v3159_v0 }
  0x9e   :  { %2606 = vmatpush3.msra.mxu1 %v3352_v13  ;;  %2615 = vmatpush3.msra.mxu0 %v3594_v11  ;;  %v3664_v13 = vand.u32 4294901760, %v754_v61  ;;  %v893_v26 = vand.u32 4294901760, %v892_v63 }
  0x9f   :  { %2607 = vmatprep.subr.mxu1 %v3159_v0  ;;  %2616 = vmatprep.subr.mxu0 %v3159_v0 }
  0xa0   :  { %2608 = vmatpush3.msra.mxu1 %v3364_v32  ;;  %2617 = vmatpush3.msra.mxu0 %v3596_v12  ;;  %v905_v32 = vand.u32 4294901760, %v3661_v8  ;;  %v3675_v38 = vsub.f32 %v754_v61, %v3664_v13  ;;  %v3738_v61 = vand.u32 4294901760, %v746_v43 }
  0xa1   :  { %2610 = vmatmul.mubr.f32.vlgmr.msra.gmra.mxu1 %v3333_v62  ;;  %2647 = vmatprep.subr.mxu1 %v3159_v0  ;;  %v886_v62 = vand.u32 4294901760, %v885_v53  ;;  %v3736_v53 = vand.u32 4294901760, %v747_v34 }
  0xa2   :  { %2679 = vmatprep.mubr.msk.f32.mxu1 %vm3160_vm0, %v3159_v0  ;;  %2618 = vmatprep.subr.mxu0 %v3159_v0  ;;  %v906_v49 = vsub.f32 %v3661_v8, %v905_v32  ;;  %v912_v56 = vand.u32 4294901760, %v3675_v38  ;;  %v3754_v42 = vsub.f32 %v746_v43, %v3738_v61 }
  0xa3   :  { %2648 = vmatpush3.msra.mxu1 %v865_v25  ;;  %2619 = vmatpush3.msra.mxu0 %v3627_v30  ;;  %v928_v25 = vand.u32 4294901760, %v927_v5  ;;  %v3751_v31 = vsub.f32 %v747_v34, %v3736_v53 }
  0xa4   :  { %2649 = vmatprep.subr.mxu1 %v3159_v0  ;;  %2620 = vmatprep.subr.mxu0 %v3159_v0  ;;  %v907_v60 = vand.u32 4294901760, %v906_v49  ;;  %v913_v9 = vsub.f32 %v3675_v38, %v912_v56  ;;  %v4326_v49 = vand.u32 4294901760, %v3746_v19 }
  0xa5   :  { %2650 = vmatpush3.msra.mxu1 %v872_v27  ;;  %2621 = vmatpush3.msra.mxu0 %v3633_v40  ;;  %v934_v27 = vsub.f32 %v3707_v39, %v933_v6 }
  0xa6   :  { %2651 = vmatprep.subr.mxu1 %v3159_v0  ;;  %2622 = vmatprep.subr.mxu0 %v3159_v0  ;;  %v914_v50 = vand.u32 4294901760, %v913_v9  ;;  %v4324_v9 = vand.u32 4294901760, %v3754_v42  ;;  %v955_v14 = vsub.f32 %v3746_v19, %v4326_v49 }
  0xa7   :  { %2652 = vmatpush3.msra.mxu1 %v879_v28  ;;  %2623 = vmatpush3.msra.mxu0 %v3641_v47  ;;  %v940_v28 = vand.u32 4294901760, %v3719_v22 }
  0xa8   :  { %2653 = vmatprep.subr.mxu1 %v3159_v0  ;;  %2624 = vmatprep.subr.mxu0 %v3159_v0  ;;  %v969_v51 = vsub.f32 %v3754_v42, %v4324_v9 }
  0xa9   :  { %2625 = vmatpush3.msra.mxu0 %v3652_v59  ;;  %2654 = vmatpush3.msra.mxu1 %v886_v62  ;;  %v935_v62 = vand.u32 4294901760, %v934_v27  ;;  %v941_v63 = vsub.f32 %v3719_v22, %v940_v28 }
  0xaa   :  { %2626 = vmatprep.subr.mxu0 %v3159_v0  ;;  %2655 = vmatprep.subr.mxu1 %v3159_v0  ;;  %v970_v24 = vand.u32 4294901760, %v969_v51 }
  0xab   :  { %2627 = vmatpush3.msra.mxu0 %v3664_v13  ;;  %2656 = vmatpush3.msra.mxu1 %v893_v26  ;;  %v4327_v26 = vand.u32 4294901760, %v3734_v48 }
  0xac   :  { %2628 = vmatprep.subr.mxu0 %v3159_v0  ;;  %2657 = vmatprep.subr.mxu1 %v3159_v0 }
  0xad   :  { %2629 = vmatpush3.msra.mxu0 %v3671_v37  ;;  %2658 = vmatpush3.msra.mxu1 %v900_v44  ;;  %v942_v44 = vand.u32 4294901760, %v941_v63  ;;  %v948_v58 = vsub.f32 %v3734_v48, %v4327_v26 }
  0xae   :  { %2630 = vmatprep.subr.mxu0 %v3159_v0  ;;  %2659 = vmatprep.subr.mxu1 %v3159_v0 }
  0xaf   :  { %2631 = vmatpush3.msra.mxu0 %v3684_v54  ;;  %2660 = vmatpush3.msra.mxu1 %v907_v60  ;;  %v4325_v60 = vand.u32 4294901760, %v3751_v31  ;;  %v949_v33 = vand.u32 4294901760, %v948_v58 }
  0xb0   :  { %2632 = vmatprep.subr.mxu0 %v3159_v0  ;;  %2661 = vmatprep.subr.mxu1 %v3159_v0 }
  0xb1   :  { %2633 = vmatpush3.msra.mxu0 %v3694_v7  ;;  %2662 = vmatpush3.msra.mxu1 %v914_v50  ;;  %v962_v50 = vsub.f32 %v3751_v31, %v4325_v60 }
  0xb2   :  { %2634 = vmatprep.subr.mxu0 %v3159_v0  ;;  %2663 = vmatprep.subr.mxu1 %v3159_v0 }
  0xb3   :  { %2635 = vmatpush3.msra.mxu0 %v3709_v41  ;;  %2664 = vmatpush3.msra.mxu1 %v921_v4  ;;  %v956_v4 = vand.u32 4294901760, %v955_v14  ;;  %v963_v5 = vand.u32 4294901760, %v962_v50  ;;  %v2093_v14 = vld [vmem:[%s4318_s2] ss:$0 sm:$0xff] }
  0xb4   :  { %2636 = vmatprep.subr.mxu0 %v3159_v0  ;;  %2665 = vmatprep.subr.mxu1 %v3159_v0 }
  0xb5   :  { %2637 = vmatpush3.msra.mxu0 %v3722_v23  ;;  %2666 = vmatpush3.msra.mxu1 %v928_v25 }
  0xb6   :  { %2638 = vmatprep.subr.mxu0 %v3159_v0  ;;  %2667 = vmatprep.subr.mxu1 %v3159_v0 }
  0xb7   :  { %2639 = vmatpush3.msra.mxu0 %v3730_v29  ;;  %2668 = vmatpush3.msra.mxu1 %v935_v62 }
  0xb8   :  { %2640 = vmatprep.subr.mxu0 %v3159_v0  ;;  %2669 = vmatprep.subr.mxu1 %v3159_v0 }
  0xb9   :  { %2641 = vmatpush3.msra.mxu0 %v3736_v53  ;;  %2670 = vmatpush3.msra.mxu1 %v942_v44 }
  0xba   :  { %2642 = vmatprep.subr.mxu0 %v3159_v0  ;;  %2671 = vmatprep.subr.mxu1 %v3159_v0 }
  0xbb   :  { %2643 = vmatpush3.msra.mxu0 %v3738_v61  ;;  %2672 = vmatpush3.msra.mxu1 %v949_v33 }
  0xbc   :  { %2682 = vmatprep.subr.mxu0 %v3159_v0  ;;  %2673 = vmatprep.subr.mxu1 %v3159_v0 }
  0xbd   :  { %2674 = vmatpush3.msra.mxu1 %v956_v4 }
  0xbe   :  { %2675 = vmatprep.subr.mxu1 %v3159_v0 }
  0xbf   :  { %2676 = vmatpush3.msra.mxu1 %v963_v5 }
  0xc0   :  { %2677 = vmatprep.subr.mxu1 %v3159_v0 }
  0xc1   :  { %2678 = vmatpush3.msra.mxu1 %v970_v24 }
  0xc2   :  { %2717 = vmatprep.subr.mxu1 %v3159_v0 }
 0x116   :  { %v191_v25 = vpop.f32.mrf.mxu0 }
 0x117   :  { %v192_v33 = vadd.f32 %v2093_v14, %v191_v25 }
 0x118   :  { %v2436_v27 = vpop.f32.mrf.mxu0 }
 0x11d   :  { %v342_v34 = vpop.f32.mrf.mxu1 }
 0x11e   :  { %v343_v51 = vadd.f32 %v342_v34, %v192_v33 }
 0x11f   :  { %v2471_v43 = vpop.f32.mrf.mxu1 }
 0x136   :  { %v446_v62 = vpop.f32.mrf.mxu0 }
 0x137   :  { %v447_v5 = vadd.f32 %v446_v62, %v343_v51 }
 0x138   :  { %v2506_v63 = vpop.f32.mrf.mxu0 }
 0x13f   :  { %v535_v44 = vpop.f32.mrf.mxu1 }
 0x140   :  { %v536_v24 = vadd.f32 %v535_v44, %v447_v5  ;;  %v1417_v44 = vld [vmem:[#allocation8 + $0x30] sm:$0xff] }
 0x141   :  { %v2541_v58 = vpop.f32.mrf.mxu1 }
 0x158   :  { %v654_v50 = vpop.f32.mrf.mxu0 }
 0x159   :  { %v655_v9 = vadd.f32 %v654_v50, %v536_v24  ;;  %v4044_v50 = vand.u32 4294901760, %v1417_v44 }
 0x15a   :  { %v2576_v4 = vpop.f32.mrf.mxu0 }
 0x15b   :  { %v1416_v4 = vld [vmem:[#allocation8 + $0x28] sm:$0xff] }
 0x161   :  { %v741_v60 = vpop.f32.mrf.mxu1 }
 0x162   :  { %v742_v49 = vadd.f32 %v741_v60, %v655_v9 }
 0x163   :  { %v2611_v27 = vpop.f32.mrf.mxu1 }
 0x164   :  { %3041 = vtanh.f32 %v742_v49  ;;  %v4057_v27 = vsub.f32 %v1417_v44, %v4044_v50 }
 0x171   :  { %v3042_v43 = vpop.eup %3041 }
 0x172   :  { %v3787_v26 = vand.u32 4294901760, %v3042_v43 }
 0x174   :  { %2680 = vmatmul.mubr.f32.vlgmr.msra.gmra.mxu1 %v3787_v26  ;;  %v3791_v63 = vsub.f32 %v3042_v43, %v3787_v26  ;;  %v4059_v43 = vand.u32 4294901760, %v1416_v4 }
 0x175   :  { %2718 = vmatpush3.msra.mxu1 %v3592_v10  ;;  %2749 = vmatprep.mubr.msk.f32.mxu1 %vm3160_vm0, %v3159_v0 }
 0x176   :  { %2719 = vmatprep.subr.mxu1 %v3159_v0  ;;  %v852_v25 = vand.u32 4294901760, %v3791_v63 }
 0x177   :  { %2720 = vmatpush3.msra.mxu1 %v3594_v11 }
 0x178   :  { %2721 = vmatprep.subr.mxu1 %v3159_v0  ;;  %v853_v49 = vsub.f32 %v3791_v63, %v852_v25 }
 0x179   :  { %2722 = vmatpush3.msra.mxu1 %v3596_v12 }
 0x17a   :  { %2723 = vmatprep.subr.mxu1 %v3159_v0  ;;  %v854_v60 = vand.u32 4294901760, %v853_v49 }
 0x17b   :  { %2724 = vmatpush3.msra.mxu1 %v3627_v30 }
 0x17c   :  { %2725 = vmatprep.subr.mxu1 %v3159_v0  ;;  %2645 = vmatmul.mubr.f32.vlgmr.msra.gmra.mxu0 %v854_v60 }
 0x17d   :  { %2683 = vmatpush3.msra.mxu0 %v3599_v15  ;;  %2726 = vmatpush3.msra.mxu1 %v3633_v40  ;;  %v4335_v15 = vand.u32 4294901760, %v3754_v42 }
 0x17e   :  { %2684 = vmatprep.subr.mxu0 %v3159_v0  ;;  %2727 = vmatprep.subr.mxu1 %v3159_v0 }
 0x17f   :  { %2685 = vmatpush3.msra.mxu0 %v3602_v16  ;;  %2728 = vmatpush3.msra.mxu1 %v3641_v47  ;;  %v1426_v16 = vld [vmem:[#allocation8 + $0x78] sm:$0xff] }
 0x180   :  { %2686 = vmatprep.subr.mxu0 %v3159_v0  ;;  %2729 = vmatprep.subr.mxu1 %v3159_v0 }
 0x181   :  { %2687 = vmatpush3.msra.mxu0 %v3605_v17  ;;  %2730 = vmatpush3.msra.mxu1 %v3652_v59  ;;  %v1425_v17 = vld [vmem:[#allocation8 + $0x70] sm:$0xff] }
 0x182   :  { %2688 = vmatprep.subr.mxu0 %v3159_v0  ;;  %2731 = vmatprep.subr.mxu1 %v3159_v0 }
 0x183   :  { %2689 = vmatpush3.msra.mxu0 %v3631_v35  ;;  %2732 = vmatpush3.msra.mxu1 %v3664_v13 }
 0x184   :  { %2690 = vmatprep.subr.mxu0 %v3159_v0  ;;  %2733 = vmatprep.subr.mxu1 %v3159_v0 }
 0x185   :  { %2691 = vmatpush3.msra.mxu0 %v3639_v46  ;;  %2734 = vmatpush3.msra.mxu1 %v3671_v37 }
 0x186   :  { %2692 = vmatprep.subr.mxu0 %v3159_v0  ;;  %2735 = vmatprep.subr.mxu1 %v3159_v0 }
 0x187   :  { %2693 = vmatpush3.msra.mxu0 %v3650_v57  ;;  %2736 = vmatpush3.msra.mxu1 %v3684_v54  ;;  %v1424_v57 = vld [vmem:[#allocation8 + $0x68] sm:$0xff] }
 0x188   :  { %2694 = vmatprep.subr.mxu0 %v3159_v0  ;;  %2737 = vmatprep.subr.mxu1 %v3159_v0 }
 0x189   :  { %2695 = vmatpush3.msra.mxu0 %v3661_v8  ;;  %2738 = vmatpush3.msra.mxu1 %v3694_v7 }
 0x18a   :  { %2696 = vmatprep.subr.mxu0 %v3159_v0  ;;  %2739 = vmatprep.subr.mxu1 %v3159_v0 }
 0x18b   :  { %2697 = vmatpush3.msra.mxu0 %v3675_v38  ;;  %2740 = vmatpush3.msra.mxu1 %v3709_v41 }
 0x18c   :  { %2698 = vmatprep.subr.mxu0 %v3159_v0  ;;  %2741 = vmatprep.subr.mxu1 %v3159_v0 }
 0x18d   :  { %2699 = vmatpush3.msra.mxu0 %v3682_v52  ;;  %2742 = vmatpush3.msra.mxu1 %v3722_v23 }
 0x18e   :  { %2700 = vmatprep.subr.mxu0 %v3159_v0  ;;  %2743 = vmatprep.subr.mxu1 %v3159_v0 }
 0x18f   :  { %2701 = vmatpush3.msra.mxu0 %v3692_v2  ;;  %2744 = vmatpush3.msra.mxu1 %v3730_v29 }
 0x190   :  { %2702 = vmatprep.subr.mxu0 %v3159_v0  ;;  %2745 = vmatprep.subr.mxu1 %v3159_v0 }
 0x191   :  { %2703 = vmatpush3.msra.mxu0 %v3707_v39  ;;  %2746 = vmatpush3.msra.mxu1 %v3736_v53 }
 0x192   :  { %2704 = vmatprep.subr.mxu0 %v3159_v0  ;;  %2747 = vmatprep.subr.mxu1 %v3159_v0 }
 0x193   :  { %2705 = vmatpush3.msra.mxu0 %v3719_v22  ;;  %2748 = vmatpush3.msra.mxu1 %v3738_v61 }
 0x194   :  { %2706 = vmatprep.subr.mxu0 %v3159_v0  ;;  %2750 = vmatmul.mubr.f32.vlgmr.msra.gmra.mxu1 %v852_v25  ;;  %v1415_v25 = vld [vmem:[#allocation8 + $0x20] sm:$0xff] }
 0x195   :  { %2787 = vmatprep.subr.mxu1 %v3159_v0  ;;  %2707 = vmatpush3.msra.mxu0 %v3734_v48 }
 0x196   :  { %2788 = vmatpush3.msra.mxu1 %v3592_v10  ;;  %2708 = vmatprep.subr.mxu0 %v3159_v0  ;;  %v4332_v10 = vand.u32 4294901760, %v3734_v48 }
 0x197   :  { %2789 = vmatprep.subr.mxu1 %v3159_v0  ;;  %2709 = vmatpush3.msra.mxu0 %v3746_v19 }
 0x198   :  { %2790 = vmatpush3.msra.mxu1 %v3594_v11  ;;  %2710 = vmatprep.subr.mxu0 %v3159_v0  ;;  %v4333_v11 = vand.u32 4294901760, %v3746_v19 }
 0x199   :  { %2791 = vmatprep.subr.mxu1 %v3159_v0  ;;  %2711 = vmatpush3.msra.mxu0 %v3751_v31 }
 0x19a   :  { %2792 = vmatpush3.msra.mxu1 %v3596_v12  ;;  %2712 = vmatprep.subr.mxu0 %v3159_v0  ;;  %v4334_v12 = vand.u32 4294901760, %v3751_v31 }
 0x19b   :  { %2793 = vmatprep.subr.mxu1 %v3159_v0  ;;  %2713 = vmatpush3.msra.mxu0 %v3754_v42 }
 0x19c   :  { %2714 = vmatprep.mubr.msk.f32.mxu0 %vm3160_vm0, %v3159_v0  ;;  %2794 = vmatpush3.msra.mxu1 %v3627_v30 }
 0x19d   :  { %2715 = vmatmul.mubr.f32.vlgmr.msra.gmra.mxu0 %v3791_v63  ;;  %2752 = vmatprep.subr.mxu0 %v3159_v0 }
 0x19e   :  { %2795 = vmatprep.subr.mxu1 %v3159_v0  ;;  %2753 = vmatpush3.msra.mxu0 %v863_v18  ;;  %v3954_v18 = vand.u32 4294901760, %v1426_v16 }
 0x19f   :  { %2796 = vmatpush3.msra.mxu1 %v3633_v40  ;;  %2754 = vmatprep.subr.mxu0 %v3159_v0 }
 0x1a0   :  { %2797 = vmatprep.subr.mxu1 %v3159_v0  ;;  %2755 = vmatpush3.msra.mxu0 %v870_v20  ;;  %v3956_v20 = vand.u32 4294901760, %v1425_v17 }
 0x1a1   :  { %2798 = vmatpush3.msra.mxu1 %v3641_v47  ;;  %2756 = vmatprep.subr.mxu0 %v3159_v0 }
 0x1a2   :  { %2799 = vmatprep.subr.mxu1 %v3159_v0  ;;  %2757 = vmatpush3.msra.mxu0 %v877_v21  ;;  %v3959_v21 = vsub.f32 %v1426_v16, %v3954_v18  ;;  %v3962_v30 = vsub.f32 %v1425_v17, %v3956_v20 }
 0x1a3   :  { %2800 = vmatpush3.msra.mxu1 %v3652_v59  ;;  %2758 = vmatprep.subr.mxu0 %v3159_v0  ;;  %v3978_v59 = vand.u32 4294901760, %v1424_v57 }
 0x1a4   :  { %2801 = vmatprep.subr.mxu1 %v3159_v0  ;;  %2759 = vmatpush3.msra.mxu0 %v884_v45  ;;  %v1528_v35 = vand.u32 4294901760, %v3959_v21  ;;  %v1535_v40 = vand.u32 4294901760, %v3962_v30 }
 0x1a5   :  { %2802 = vmatpush3.msra.mxu1 %v3664_v13  ;;  %2760 = vmatprep.subr.mxu0 %v3159_v0  ;;  %v3981_v8 = vsub.f32 %v1424_v57, %v3978_v59 }
 0x1a6   :  { %2803 = vmatprep.subr.mxu1 %v3159_v0  ;;  %2761 = vmatpush3.msra.mxu0 %v891_v55  ;;  %v1529_v45 = vsub.f32 %v3959_v21, %v1528_v35  ;;  %v1536_v46 = vsub.f32 %v3962_v30, %v1535_v40 }
 0x1a7   :  { %2804 = vmatpush3.msra.mxu1 %v3671_v37  ;;  %2762 = vmatprep.subr.mxu0 %v3159_v0  ;;  %v1542_v37 = vand.u32 4294901760, %v3981_v8 }
 0x1a8   :  { %2805 = vmatprep.subr.mxu1 %v3159_v0  ;;  %2763 = vmatpush3.msra.mxu0 %v898_v3  ;;  %v1530_v47 = vand.u32 4294901760, %v1529_v45  ;;  %v1537_v55 = vand.u32 4294901760, %v1536_v46  ;;  %v1423_v3 = vld [vmem:[#allocation8 + $0x60] sm:$0xff] }
 0x1a9   :  { %2806 = vmatpush3.msra.mxu1 %v3684_v54  ;;  %2764 = vmatprep.subr.mxu0 %v3159_v0  ;;  %v3983_v13 = vand.u32 4294901760, %v1423_v3  ;;  %v1421_v54 = vld [vmem:[#allocation8 + $0x50] sm:$0xff] }
 0x1aa   :  { %2807 = vmatprep.subr.mxu1 %v3159_v0  ;;  %2765 = vmatpush3.msra.mxu0 %v905_v32  ;;  %v1422_v32 = vld [vmem:[#allocation8 + $0x58] sm:$0xff] }
 0x1ab   :  { %2808 = vmatpush3.msra.mxu1 %v3694_v7  ;;  %2766 = vmatprep.subr.mxu0 %v3159_v0  ;;  %v3989_v38 = vsub.f32 %v1423_v3, %v3983_v13  ;;  %v3991_v52 = vand.u32 4294901760, %v1422_v32  ;;  %v4002_v7 = vand.u32 4294901760, %v1421_v54 }
 0x1ac   :  { %2809 = vmatprep.subr.mxu1 %v3159_v0  ;;  %2767 = vmatpush3.msra.mxu0 %v912_v56  ;;  %v1543_v56 = vsub.f32 %v3981_v8, %v1542_v37 }
 0x1ad   :  { %2810 = vmatpush3.msra.mxu1 %v3709_v41  ;;  %2768 = vmatprep.subr.mxu0 %v3159_v0  ;;  %v4000_v2 = vsub.f32 %v1422_v32, %v3991_v52  ;;  %v4011_v22 = vsub.f32 %v1421_v54, %v4002_v7 }
 0x1ae   :  { %2811 = vmatprep.subr.mxu1 %v3159_v0  ;;  %2769 = vmatpush3.msra.mxu0 %v919_v1  ;;  %v1549_v1 = vand.u32 4294901760, %v3989_v38  ;;  %v1544_v39 = vand.u32 4294901760, %v1543_v56  ;;  %v1412_v56 = vld [vmem:[#allocation8 + $0x8] sm:$0xff] }
 0x1af   :  { %2812 = vmatpush3.msra.mxu1 %v3722_v23  ;;  %2770 = vmatprep.subr.mxu0 %v3159_v0 }
 0x1b0   :  { %2813 = vmatprep.subr.mxu1 %v3159_v0  ;;  %2771 = vmatpush3.msra.mxu0 %v926_v36  ;;  %v1420_v36 = vld [vmem:[#allocation8 + $0x48] sm:$0xff]  ;;  %v1550_v41 = vsub.f32 %v3989_v38, %v1549_v1 }
 0x1b1   :  { %2814 = vmatpush3.msra.mxu1 %v3730_v29  ;;  %2772 = vmatprep.subr.mxu0 %v3159_v0  ;;  %v4014_v23 = vand.u32 4294901760, %v1420_v36 }
 0x1b2   :  { %2815 = vmatprep.subr.mxu1 %v3159_v0  ;;  %2773 = vmatpush3.msra.mxu0 %v933_v6  ;;  %v1556_v6 = vand.u32 4294901760, %v4000_v2  ;;  %v1551_v29 = vand.u32 4294901760, %v1550_v41  ;;  %v4098_v41 = vand.u32 4294901760, %v1412_v56 }
 0x1b3   :  { %2816 = vmatpush3.msra.mxu1 %v3736_v53  ;;  %2774 = vmatprep.subr.mxu0 %v3159_v0  ;;  %v1563_v53 = vand.u32 4294901760, %v4011_v22  ;;  %v4025_v19 = vsub.f32 %v1420_v36, %v4014_v23  ;;  %v1411_v36 = vld [vmem:[#allocation8] sm:$0xff] }
 0x1b4   :  { %2817 = vmatprep.subr.mxu1 %v3159_v0  ;;  %2775 = vmatpush3.msra.mxu0 %v940_v28  ;;  %v1419_v28 = vld [vmem:[#allocation8 + $0x40] sm:$0xff]  ;;  %v1557_v48 = vsub.f32 %v4000_v2, %v1556_v6 }
 0x1b5   :  { %2818 = vmatpush3.msra.mxu1 %v3738_v61  ;;  %2819 = vmatprep.mubr.msk.f32.mxu1 %vm3160_vm0, %v3159_v0  ;;  %v4021_v61 = vand.u32 4294901760, %v1419_v28  ;;  %v1564_v42 = vsub.f32 %v4011_v22, %v1563_v53  ;;  %v1570_v62 = vand.u32 4294901760, %v4025_v19 }
 0x1b6   :  { %2776 = vmatprep.subr.mxu0 %v3159_v0  ;;  %2820 = vmatmul.mubr.f32.vlgmr.msra.gmra.mxu1 %v3787_v26  ;;  %v1558_v31 = vand.u32 4294901760, %v1557_v48 }
 0x1b7   :  { %2777 = vmatpush3.msra.mxu0 %v4332_v10  ;;  %2784 = vmatprep.mubr.msk.f32.mxu0 %vm3160_vm0, %v3159_v0  ;;  %v4032_v9 = vsub.f32 %v1419_v28, %v4021_v61  ;;  %v1565_v58 = vand.u32 4294901760, %v1564_v42  ;;  %v1571_v51 = vsub.f32 %v4025_v19, %v1570_v62  ;;  %v1591_v10 = vand.u32 4294901760, %v4057_v27 }
 0x1b8   :  { %2778 = vmatprep.subr.mxu0 %v3159_v0  ;;  %2857 = vmatprep.subr.mxu1 %v3159_v0  ;;  %v4100_v28 = vand.u32 4294901760, %v1411_v36  ;;  %v4113_v42 = vsub.f32 %v1412_v56, %v4098_v41 }
 0x1b9   :  { %2779 = vmatpush3.msra.mxu0 %v4333_v11  ;;  %2889 = vmatprep.mubr.msk.f32.mxu1 %vm3160_vm0, %v3159_v0  ;;  %v1577_v14 = vand.u32 4294901760, %v4032_v9  ;;  %v1572_v63 = vand.u32 4294901760, %v1571_v51  ;;  %v4069_v11 = vsub.f32 %v1416_v4, %v4059_v43  ;;  %v1592_v17 = vsub.f32 %v4057_v27, %v1591_v10 }
 0x1ba   :  { %2780 = vmatprep.subr.mxu0 %v3159_v0  ;;  %2858 = vmatpush3.msra.mxu1 %v1530_v47  ;;  %v4116_v44 = vsub.f32 %v1411_v36, %v4100_v28 }
 0x1bb   :  { %2781 = vmatpush3.msra.mxu0 %v4334_v12  ;;  %2859 = vmatprep.subr.mxu1 %v3159_v0  ;;  %v1578_v5 = vsub.f32 %v4032_v9, %v1577_v14  ;;  %v4072_v12 = vand.u32 4294901760, %v1415_v25  ;;  %v1598_v45 = vand.u32 4294901760, %v4069_v11  ;;  %v1593_v57 = vand.u32 4294901760, %v1592_v17 }
 0x1bc   :  { %2782 = vmatprep.subr.mxu0 %v3159_v0  ;;  %2860 = vmatpush3.msra.mxu1 %v1537_v55  ;;  %v1413_v55 = vld [vmem:[#allocation8 + $0x10] sm:$0xff] }
 0x1bd   :  { %2783 = vmatpush3.msra.mxu0 %v4335_v15  ;;  %2861 = vmatprep.subr.mxu1 %v3159_v0  ;;  %v1579_v49 = vand.u32 4294901760, %v1578_v5  ;;  %v1414_v15 = vld [vmem:[#allocation8 + $0x18] sm:$0xff]  ;;  %v4084_v47 = vsub.f32 %v1415_v25, %v4072_v12  ;;  %v1599_v3 = vsub.f32 %v4069_v11, %v1598_v45  ;;  %v4094_v54 = vand.u32 4294901760, %v1413_v55 }
 0x1be   :  { %2785 = vmatmul.mubr.f32.vlgmr.msra.gmra.mxu0 %v3787_v26  ;;  %2822 = vmatprep.subr.mxu0 %v3159_v0  ;;  %v1418_v26 = vld [vmem:[#allocation8 + $0x38] sm:$0xff]  ;;  %v4080_v46 = vand.u32 4294901760, %v1414_v15  ;;  %v4329_v5 = vand.u32 4294901760, %v4113_v42 }
 0x1bf   :  { %2854 = vmatprep.mubr.msk.f32.mxu0 %vm3160_vm0, %v3159_v0  ;;  %2823 = vmatpush3.msra.mxu0 %v3954_v18  ;;  %v4034_v34 = vand.u32 4294901760, %v1418_v26 }
 0x1c0   :  { %2824 = vmatprep.subr.mxu0 %v3159_v0  ;;  %2862 = vmatpush3.msra.mxu1 %v1544_v39  ;;  %v4092_v32 = vsub.f32 %v1414_v15, %v4080_v46  ;;  %v1605_v39 = vand.u32 4294901760, %v4084_v47 }
 0x1c1   :  { %2825 = vmatpush3.msra.mxu0 %v3956_v20  ;;  %2863 = vmatprep.subr.mxu1 %v3159_v0  ;;  %v4042_v33 = vsub.f32 %v1418_v26, %v4034_v34  ;;  %v4106_v26 = vsub.f32 %v1413_v55, %v4094_v54 }
 0x1c2   :  { %2826 = vmatprep.subr.mxu0 %v3159_v0  ;;  %2864 = vmatpush3.msra.mxu1 %v1551_v29  ;;  %v1600_v29 = vand.u32 4294901760, %v1599_v3  ;;  %v4331_v48 = vand.u32 4294901760, %v4092_v32 }
 0x1c3   :  { %2827 = vmatpush3.msra.mxu0 %v3978_v59  ;;  %2865 = vmatprep.subr.mxu1 %v3159_v0  ;;  %v1584_v24 = vand.u32 4294901760, %v4042_v33  ;;  %v4330_v51 = vand.u32 4294901760, %v4106_v26 }
 0x1c4   :  { %2828 = vmatprep.subr.mxu0 %v3159_v0  ;;  %2866 = vmatpush3.msra.mxu1 %v1558_v31  ;;  %v1606_v31 = vsub.f32 %v4084_v47, %v1605_v39 }
 0x1c5   :  { %2829 = vmatpush3.msra.mxu0 %v3983_v13  ;;  %2867 = vmatprep.subr.mxu1 %v3159_v0  ;;  %v1585_v60 = vsub.f32 %v4042_v33, %v1584_v24 }
 0x1c6   :  { %2830 = vmatprep.subr.mxu0 %v3159_v0  ;;  %2868 = vmatpush3.msra.mxu1 %v1565_v58  ;;  %v1613_v58 = vsub.f32 %v4092_v32, %v4331_v48  ;;  %v1607_v4 = vand.u32 4294901760, %v1606_v31 }
 0x1c7   :  { %2831 = vmatpush3.msra.mxu0 %v3991_v52  ;;  %2869 = vmatprep.subr.mxu1 %v3159_v0  ;;  %v1586_v16 = vand.u32 4294901760, %v1585_v60  ;;  %v1627_v60 = vsub.f32 %v4113_v42, %v4329_v5 }
 0x1c8   :  { %2832 = vmatprep.subr.mxu0 %v3159_v0  ;;  %2870 = vmatpush3.msra.mxu1 %v1572_v63  ;;  %v4328_v63 = vand.u32 4294901760, %v4116_v44  ;;  %v1614_v25 = vand.u32 4294901760, %v1613_v58 }
 0x1c9   :  { %2833 = vmatpush3.msra.mxu0 %v4002_v7  ;;  %2871 = vmatprep.subr.mxu1 %v3159_v0  ;;  %v1628_v17 = vand.u32 4294901760, %v1627_v60 }
 0x1ca   :  { %2834 = vmatprep.subr.mxu0 %v3159_v0  ;;  %2872 = vmatpush3.msra.mxu1 %v1579_v49  ;;  %v1620_v49 = vsub.f32 %v4106_v26, %v4330_v51  ;;  %v1634_v15 = vsub.f32 %v4116_v44, %v4328_v63 }
 0x1cb   :  { %2835 = vmatpush3.msra.mxu0 %v4014_v23  ;;  %2873 = vmatprep.subr.mxu1 %v3159_v0 }
 0x1cc   :  { %2836 = vmatprep.subr.mxu0 %v3159_v0  ;;  %2874 = vmatpush3.msra.mxu1 %v1586_v16  ;;  %v1621_v16 = vand.u32 4294901760, %v1620_v49  ;;  %v1635_v55 = vand.u32 4294901760, %v1634_v15 }
 0x1cd   :  { %2837 = vmatpush3.msra.mxu0 %v4021_v61  ;;  %2875 = vmatprep.subr.mxu1 %v3159_v0 }
 0x1ce   :  { %2838 = vmatprep.subr.mxu0 %v3159_v0  ;;  %2876 = vmatpush3.msra.mxu1 %v1593_v57 }
 0x1cf   :  { %2839 = vmatpush3.msra.mxu0 %v4034_v34  ;;  %2877 = vmatprep.subr.mxu1 %v3159_v0 }
 0x1d0   :  { %2840 = vmatprep.subr.mxu0 %v3159_v0  ;;  %2878 = vmatpush3.msra.mxu1 %v1600_v29 }
 0x1d1   :  { %2841 = vmatpush3.msra.mxu0 %v4044_v50  ;;  %2879 = vmatprep.subr.mxu1 %v3159_v0 }
 0x1d2   :  { %2842 = vmatprep.subr.mxu0 %v3159_v0  ;;  %2880 = vmatpush3.msra.mxu1 %v1607_v4 }
 0x1d3   :  { %2843 = vmatpush3.msra.mxu0 %v4059_v43  ;;  %2881 = vmatprep.subr.mxu1 %v3159_v0 }
 0x1d4   :  { %2844 = vmatprep.subr.mxu0 %v3159_v0  ;;  %2882 = vmatpush3.msra.mxu1 %v1614_v25  ;;  %v2094_v25 = vld [vmem:[%s4320_s4] ss:$0 sm:$0xff] }
 0x1d5   :  { %2845 = vmatpush3.msra.mxu0 %v4072_v12  ;;  %2883 = vmatprep.subr.mxu1 %v3159_v0 }
 0x1d6   :  { %2846 = vmatprep.subr.mxu0 %v3159_v0  ;;  %2884 = vmatpush3.msra.mxu1 %v1621_v16 }
 0x1d7   :  { %2847 = vmatpush3.msra.mxu0 %v4080_v46  ;;  %2885 = vmatprep.subr.mxu1 %v3159_v0 }
 0x1d8   :  { %2848 = vmatprep.subr.mxu0 %v3159_v0  ;;  %2886 = vmatpush3.msra.mxu1 %v1628_v17 }
 0x1d9   :  { %2849 = vmatpush3.msra.mxu0 %v4094_v54  ;;  %2887 = vmatprep.subr.mxu1 %v3159_v0 }
 0x1da   :  { %2850 = vmatprep.subr.mxu0 %v3159_v0  ;;  %2888 = vmatpush3.msra.mxu1 %v1635_v55 }
 0x1db   :  { %2851 = vmatpush3.msra.mxu0 %v4098_v41  ;;  %2927 = vmatprep.subr.mxu1 %v3159_v0 }
 0x1dc   :  { %2852 = vmatprep.subr.mxu0 %v3159_v0 }
 0x1dd   :  { %2853 = vmatpush3.msra.mxu0 %v4100_v28 }
 0x1de   :  { %2892 = vmatprep.subr.mxu0 %v3159_v0 }
 0x234   :  { %v1007_v57 = vpop.f32.mrf.mxu1 }
 0x236   :  { %v2681_v3 = vpop.f32.mrf.mxu1 }
 0x23c   :  { %v856_v56 = vpop.f32.mrf.mxu0 }
 0x23d   :  { %v857_v49 = vadd.f32 %v2094_v25, %v856_v56 }
 0x23e   :  { %v2646_v36 = vpop.f32.mrf.mxu0 }
 0x23f   :  { %v1008_v15 = vadd.f32 %v1007_v57, %v857_v49 }
 0x254   :  { %v1200_v29 = vpop.f32.mrf.mxu1 }
 0x256   :  { %v2751_v31 = vpop.f32.mrf.mxu1 }
 0x25d   :  { %v1111_v58 = vpop.f32.mrf.mxu0 }
 0x25e   :  { %v1112_v17 = vadd.f32 %v1111_v58, %v1008_v15 }
 0x25f   :  { %v2716_v4 = vpop.f32.mrf.mxu0 }
 0x260   :  { %v1201_v55 = vadd.f32 %v1200_v29, %v1112_v17 }
 0x276   :  { %v1406_v60 = vpop.f32.mrf.mxu1 }
 0x278   :  { %v2821_v16 = vpop.f32.mrf.mxu1 }
 0x27e   :  { %v1319_v63 = vpop.f32.mrf.mxu0 }
 0x27f   :  { %v1320_v5 = vadd.f32 %v1319_v63, %v1201_v55 }
 0x280   :  { %v2786_v51 = vpop.f32.mrf.mxu0 }
 0x281   :  { %v1407_v3 = vadd.f32 %v1406_v60, %v1320_v5 }
 0x283   :  { %3043 = vtanh.f32 %v1407_v3 }
 0x290   :  { %v3044_v36 = vpop.eup %3043 }
 0x291   :  { %v4149_v48 = vand.u32 4294901760, %v3044_v36 }
 0x293   :  { %2890 = vmatmul.mubr.f32.vlgmr.msra.gmra.mxu1 %v4149_v48  ;;  %v4153_v31 = vsub.f32 %v3044_v36, %v4149_v48 }
 0x294   :  { %2928 = vmatpush3.msra.mxu1 %v3954_v18  ;;  %2959 = vmatprep.mubr.msk.f32.mxu1 %vm3160_vm0, %v3159_v0 }
 0x295   :  { %2929 = vmatprep.subr.mxu1 %v3159_v0  ;;  %v1517_v63 = vand.u32 4294901760, %v4153_v31 }
 0x296   :  { %2930 = vmatpush3.msra.mxu1 %v3956_v20 }
 0x297   :  { %2931 = vmatprep.subr.mxu1 %v3159_v0  ;;  %v1518_v51 = vsub.f32 %v4153_v31, %v1517_v63 }
 0x298   :  { %2932 = vmatpush3.msra.mxu1 %v3978_v59 }
 0x299   :  { %2933 = vmatprep.subr.mxu1 %v3159_v0  ;;  %v1519_v5 = vand.u32 4294901760, %v1518_v51 }
 0x29a   :  { %2934 = vmatpush3.msra.mxu1 %v3983_v13 }
 0x29b   :  { %2935 = vmatprep.subr.mxu1 %v3159_v0  ;;  %2855 = vmatmul.mubr.f32.vlgmr.msra.gmra.mxu0 %v1519_v5 }
 0x29c   :  { %2893 = vmatpush3.msra.mxu0 %v3959_v21  ;;  %2936 = vmatpush3.msra.mxu1 %v3991_v52  ;;  %v4338_v21 = vand.u32 4294901760, %v4113_v42 }
 0x29d   :  { %2894 = vmatprep.subr.mxu0 %v3159_v0  ;;  %2937 = vmatprep.subr.mxu1 %v3159_v0 }
 0x29e   :  { %2895 = vmatpush3.msra.mxu0 %v3962_v30  ;;  %2938 = vmatpush3.msra.mxu1 %v4002_v7  ;;  %v4339_v30 = vand.u32 4294901760, %v4116_v44 }
 0x29f   :  { %2896 = vmatprep.subr.mxu0 %v3159_v0  ;;  %2939 = vmatprep.subr.mxu1 %v3159_v0 }
 0x2a0   :  { %2897 = vmatpush3.msra.mxu0 %v3981_v8  ;;  %2940 = vmatpush3.msra.mxu1 %v4014_v23 }
 0x2a1   :  { %2898 = vmatprep.subr.mxu0 %v3159_v0  ;;  %2941 = vmatprep.subr.mxu1 %v3159_v0 }
 0x2a2   :  { %2899 = vmatpush3.msra.mxu0 %v3989_v38  ;;  %2942 = vmatpush3.msra.mxu1 %v4021_v61 }
 0x2a3   :  { %2900 = vmatprep.subr.mxu0 %v3159_v0  ;;  %2943 = vmatprep.subr.mxu1 %v3159_v0 }
 0x2a4   :  { %2901 = vmatpush3.msra.mxu0 %v4000_v2  ;;  %2944 = vmatpush3.msra.mxu1 %v4034_v34 }
 0x2a5   :  { %2902 = vmatprep.subr.mxu0 %v3159_v0  ;;  %2945 = vmatprep.subr.mxu1 %v3159_v0 }
 0x2a6   :  { %2903 = vmatpush3.msra.mxu0 %v4011_v22  ;;  %2946 = vmatpush3.msra.mxu1 %v4044_v50 }
 0x2a7   :  { %2904 = vmatprep.subr.mxu0 %v3159_v0  ;;  %2947 = vmatprep.subr.mxu1 %v3159_v0 }
 0x2a8   :  { %2905 = vmatpush3.msra.mxu0 %v4025_v19  ;;  %2948 = vmatpush3.msra.mxu1 %v4059_v43 }
 0x2a9   :  { %2906 = vmatprep.subr.mxu0 %v3159_v0  ;;  %2949 = vmatprep.subr.mxu1 %v3159_v0 }
 0x2aa   :  { %2907 = vmatpush3.msra.mxu0 %v4032_v9  ;;  %2950 = vmatpush3.msra.mxu1 %v4072_v12 }
 0x2ab   :  { %2908 = vmatprep.subr.mxu0 %v3159_v0  ;;  %2951 = vmatprep.subr.mxu1 %v3159_v0 }
 0x2ac   :  { %2909 = vmatpush3.msra.mxu0 %v4042_v33  ;;  %2952 = vmatpush3.msra.mxu1 %v4080_v46 }
 0x2ad   :  { %2910 = vmatprep.subr.mxu0 %v3159_v0  ;;  %2953 = vmatprep.subr.mxu1 %v3159_v0 }
 0x2ae   :  { %2911 = vmatpush3.msra.mxu0 %v4057_v27  ;;  %2954 = vmatpush3.msra.mxu1 %v4094_v54 }
 0x2af   :  { %2912 = vmatprep.subr.mxu0 %v3159_v0  ;;  %2955 = vmatprep.subr.mxu1 %v3159_v0 }
 0x2b0   :  { %2913 = vmatpush3.msra.mxu0 %v4069_v11  ;;  %2956 = vmatpush3.msra.mxu1 %v4098_v41 }
 0x2b1   :  { %2914 = vmatprep.subr.mxu0 %v3159_v0  ;;  %2957 = vmatprep.subr.mxu1 %v3159_v0 }
 0x2b2   :  { %2915 = vmatpush3.msra.mxu0 %v4084_v47  ;;  %2958 = vmatpush3.msra.mxu1 %v4100_v28 }
 0x2b3   :  { %2916 = vmatprep.subr.mxu0 %v3159_v0  ;;  %2960 = vmatmul.mubr.f32.vlgmr.msra.gmra.mxu1 %v1517_v63 }
 0x2b4   :  { %2997 = vmatprep.subr.mxu1 %v3159_v0  ;;  %2917 = vmatpush3.msra.mxu0 %v4092_v32 }
 0x2b5   :  { %2998 = vmatpush3.msra.mxu1 %v3954_v18  ;;  %2918 = vmatprep.subr.mxu0 %v3159_v0  ;;  %v4336_v18 = vand.u32 4294901760, %v4092_v32 }
 0x2b6   :  { %2999 = vmatprep.subr.mxu1 %v3159_v0  ;;  %2919 = vmatpush3.msra.mxu0 %v4106_v26 }
 0x2b7   :  { %3000 = vmatpush3.msra.mxu1 %v3956_v20  ;;  %2920 = vmatprep.subr.mxu0 %v3159_v0  ;;  %v4337_v20 = vand.u32 4294901760, %v4106_v26 }
 0x2b8   :  { %3001 = vmatprep.subr.mxu1 %v3159_v0  ;;  %2921 = vmatpush3.msra.mxu0 %v4113_v42 }
 0x2b9   :  { %3002 = vmatpush3.msra.mxu1 %v3978_v59  ;;  %2922 = vmatprep.subr.mxu0 %v3159_v0 }
 0x2ba   :  { %3003 = vmatprep.subr.mxu1 %v3159_v0  ;;  %2923 = vmatpush3.msra.mxu0 %v4116_v44 }
 0x2bb   :  { %2924 = vmatprep.mubr.msk.f32.mxu0 %vm3160_vm0, %v3159_v0  ;;  %3004 = vmatpush3.msra.mxu1 %v3983_v13 }
 0x2bc   :  { %2925 = vmatmul.mubr.f32.vlgmr.msra.gmra.mxu0 %v4153_v31  ;;  %2962 = vmatprep.subr.mxu0 %v3159_v0 }
 0x2bd   :  { %3005 = vmatprep.subr.mxu1 %v3159_v0  ;;  %2963 = vmatpush3.msra.mxu0 %v1528_v35 }
 0x2be   :  { %3006 = vmatpush3.msra.mxu1 %v3991_v52  ;;  %2964 = vmatprep.subr.mxu0 %v3159_v0 }
 0x2bf   :  { %3007 = vmatprep.subr.mxu1 %v3159_v0  ;;  %2965 = vmatpush3.msra.mxu0 %v1535_v40 }
 0x2c0   :  { %3008 = vmatpush3.msra.mxu1 %v4002_v7  ;;  %2966 = vmatprep.subr.mxu0 %v3159_v0 }
 0x2c1   :  { %3009 = vmatprep.subr.mxu1 %v3159_v0  ;;  %2967 = vmatpush3.msra.mxu0 %v1542_v37 }
 0x2c2   :  { %3010 = vmatpush3.msra.mxu1 %v4014_v23  ;;  %2968 = vmatprep.subr.mxu0 %v3159_v0 }
 0x2c3   :  { %3011 = vmatprep.subr.mxu1 %v3159_v0  ;;  %2969 = vmatpush3.msra.mxu0 %v1549_v1  ;;  %v2095_v1 = vld [vmem:[%s4322_s6] ss:$0 sm:$0xff] }
 0x2c4   :  { %3012 = vmatpush3.msra.mxu1 %v4021_v61  ;;  %2970 = vmatprep.subr.mxu0 %v3159_v0 }
 0x2c5   :  { %3013 = vmatprep.subr.mxu1 %v3159_v0  ;;  %2971 = vmatpush3.msra.mxu0 %v1556_v6 }
 0x2c6   :  { %3014 = vmatpush3.msra.mxu1 %v4034_v34  ;;  %2972 = vmatprep.subr.mxu0 %v3159_v0 }
 0x2c7   :  { %3015 = vmatprep.subr.mxu1 %v3159_v0  ;;  %2973 = vmatpush3.msra.mxu0 %v1563_v53 }
 0x2c8   :  { %3016 = vmatpush3.msra.mxu1 %v4044_v50  ;;  %2974 = vmatprep.subr.mxu0 %v3159_v0 }
 0x2c9   :  { %3017 = vmatprep.subr.mxu1 %v3159_v0  ;;  %2975 = vmatpush3.msra.mxu0 %v1570_v62 }
 0x2ca   :  { %3018 = vmatpush3.msra.mxu1 %v4059_v43  ;;  %2976 = vmatprep.subr.mxu0 %v3159_v0 }
 0x2cb   :  { %3019 = vmatprep.subr.mxu1 %v3159_v0  ;;  %2977 = vmatpush3.msra.mxu0 %v1577_v14 }
 0x2cc   :  { %3020 = vmatpush3.msra.mxu1 %v4072_v12  ;;  %2978 = vmatprep.subr.mxu0 %v3159_v0 }
 0x2cd   :  { %3021 = vmatprep.subr.mxu1 %v3159_v0  ;;  %2979 = vmatpush3.msra.mxu0 %v1584_v24 }
 0x2ce   :  { %3022 = vmatpush3.msra.mxu1 %v4080_v46  ;;  %2980 = vmatprep.subr.mxu0 %v3159_v0 }
 0x2cf   :  { %3023 = vmatprep.subr.mxu1 %v3159_v0  ;;  %2981 = vmatpush3.msra.mxu0 %v1591_v10 }
 0x2d0   :  { %3024 = vmatpush3.msra.mxu1 %v4094_v54  ;;  %2982 = vmatprep.subr.mxu0 %v3159_v0 }
 0x2d1   :  { %3025 = vmatprep.subr.mxu1 %v3159_v0  ;;  %2983 = vmatpush3.msra.mxu0 %v1598_v45 }
 0x2d2   :  { %3026 = vmatpush3.msra.mxu1 %v4098_v41  ;;  %2984 = vmatprep.subr.mxu0 %v3159_v0 }
 0x2d3   :  { %3027 = vmatprep.subr.mxu1 %v3159_v0  ;;  %2985 = vmatpush3.msra.mxu0 %v1605_v39 }
 0x2d4   :  { %3028 = vmatpush3.msra.mxu1 %v4100_v28  ;;  %3029 = vmatprep.mubr.msk.f32.mxu1 %vm3160_vm0, %v3159_v0 }
 0x2d5   :  { %2986 = vmatprep.subr.mxu0 %v3159_v0  ;;  %3030 = vmatmul.mubr.f32.vlgmr.msra.gmra.mxu1 %v4149_v48 }
 0x2d6   :  { %2987 = vmatpush3.msra.mxu0 %v4336_v18  ;;  %2994 = vmatprep.mubr.msk.f32.mxu0 %vm3160_vm0, %v3159_v0 }
 0x2d7   :  { %2988 = vmatprep.subr.mxu0 %v3159_v0 }
 0x2d8   :  { %2989 = vmatpush3.msra.mxu0 %v4337_v20 }
 0x2d9   :  { %2990 = vmatprep.subr.mxu0 %v3159_v0 }
 0x2da   :  { %2991 = vmatpush3.msra.mxu0 %v4338_v21 }
 0x2db   :  { %2992 = vmatprep.subr.mxu0 %v3159_v0 }
 0x2dc   :  { %2993 = vmatpush3.msra.mxu0 %v4339_v30 }
 0x2dd   :  { %2995 = vmatmul.mubr.f32.vlgmr.msra.gmra.mxu0 %v4149_v48 }
 0x353   :  { %v1672_v35 = vpop.f32.mrf.mxu1 }
 0x355   :  { %v2891_v40 = vpop.f32.mrf.mxu1 }
 0x35b   :  { %v1521_v59 = vpop.f32.mrf.mxu0 }
 0x35c   :  { %v1522_v2 = vadd.f32 %v2095_v1, %v1521_v59 }
 0x35d   :  { %v2856_v8 = vpop.f32.mrf.mxu0 }
 0x35e   :  { %v1673_v0 = vadd.f32 %v1672_v35, %v1522_v2 }
 0x373   :  { %v1865_v13 = vpop.f32.mrf.mxu1 }
 0x375   :  { %v2961_v37 = vpop.f32.mrf.mxu1 }
 0x37c   :  { %v1776_v38 = vpop.f32.mrf.mxu0 }
 0x37d   :  { %v1777_v22 = vadd.f32 %v1776_v38, %v1673_v0 }
 0x37e   :  { %v2926_v52 = vpop.f32.mrf.mxu0 }
 0x37f   :  { %v1866_v23 = vadd.f32 %v1865_v13, %v1777_v22 }
 0x395   :  { %v2071_v7 = vpop.f32.mrf.mxu1 }
 0x397   :  { %v3031_v6 = vpop.f32.mrf.mxu1 }
 0x39d   :  { %v1984_v53 = vpop.f32.mrf.mxu0 }
 0x39e   :  { %v1985_v61 = vadd.f32 %v1984_v53, %v1866_v23 }
 0x39f   :  { %v2996_v19 = vpop.f32.mrf.mxu0 }
 0x3a0   :  { %v2072_v9 = vadd.f32 %v2071_v7, %v1985_v61 }
 0x3a2   :  { %2075 = vst [vmem:[#allocation10] sm:$0xff] %v2072_v9 }
 0x3a3   :  { %3136 = shalt.err (!%p3133_p10)
}
 0x3a4   :  { %2085 = dma.vmem_to_hbm [thread:$0]  %s2083_s24, 128, %s4323_s7, [#allocation4]  }
 0x3a5   :  { %3151 = dma.done.wait [#allocation4], 128  }
 0x3a6   :  { %3152 = vsyncadd [#allocation4], 4294967168 }
 0x3a7   :  { %2089 = vsyncpa [#allocation3], 1 }
 0x3a8   :  { %2090 = vsyncpa [#allocation6], 1 }
 0x3a9   :  { %2091 = vsyncpa [#allocation9], 1 }
 0x3aa   :  { %2092 = vsyncpa [#allocation4], 1 }

</bundles_post_ra>
